<compile_context>
chip_gen: v7x
topology: tpu7x:2x2x1
jax: 0.10.0
libtpu: 0.0.40
codegen_flags: <defaults>
</compile_context>

<pallas_src>
import jax
import jax.numpy as jnp
from jax.experimental import pallas as pl
from jax.experimental.pallas import tpu as pltpu

EPS = 1e-5
HIDDEN = 512
TB = 128                    # HIDDEN column-block width (grid axis)
NBLK = HIDDEN // TB


def _gcn_kernel(x_ref, a_ref, w1_ref, w2_ref, fc1w_ref, vecf_ref, vecc_ref,
                out_ref, h_ref, acc_ref):
    # vecf_ref rows (f32, (8, HIDDEN)) -- full-width params:
    #   0 = b1 (conv1 bias)    1 = fc1 bias        2 = fc2 weight row (lane-dense)
    #   3 = fc2 bias (lane 0)  4 = BN1 scale (lanes 0..C_in)  5 = BN1 shift
    # vecc_ref rows (f32, (8, TB)) -- column block j of:
    #   0 = c2 = t2 @ W2       1 = b2 (conv2 bias) 2 = BN3 scale   3 = BN3 shift
    j = pl.program_id(0)
    a = a_ref[...]                              # (N, N) bf16 normalized adjacency

    @pl.when(j == 0)
    def _():
        c_in = x_ref.shape[1]
        # BatchNorm1 folded to affine on the tiny (N, C_in) tile.
        xb = x_ref[...] * vecf_ref[4:5, :c_in] + vecf_ref[5:6, :c_in]
        # GCNConv1 reassociated: (A_hat @ x_bn) @ W1 + b1, then ReLU.
        agg = jnp.dot(a, xb.astype(jnp.bfloat16), preferred_element_type=jnp.float32)
        h = jnp.dot(agg.astype(jnp.bfloat16), w1_ref[...],
                    preferred_element_type=jnp.float32) + vecf_ref[0:1, :]
        h_ref[...] = jnp.maximum(h, 0.0).astype(h_ref.dtype)
        acc_ref[...] = jnp.zeros_like(acc_ref)

    # ---- conv2 / BN3 / max-pool / fc1-partial for column block j (exact) ----
    # z_j = BN2(h) @ W2[:, cols] = h @ W2_eff[:, cols] + c2[cols]
    z = jnp.dot(h_ref[...], w2_ref[...],
                preferred_element_type=jnp.float32) + vecc_ref[0:1, :]
    h2 = jnp.dot(a, z.astype(jnp.bfloat16),
                 preferred_element_type=jnp.float32) + vecc_ref[1:2, :]
    h2 = jnp.maximum(h2, 0.0)
    h2 = h2 * vecc_ref[2:3, :] + vecc_ref[3:4, :]             # BN3 affine
    g = jnp.max(h2, axis=0, keepdims=True)                    # global max-pool, (1, TB)
    # fc1 is a K-reduction over pooled columns: accumulate g_j @ fc1_w[rows_j, :].
    acc_ref[...] += jnp.dot(g.astype(jnp.bfloat16), fc1w_ref[...],
                            preferred_element_type=jnp.float32)

    @pl.when(j == pl.num_programs(0) - 1)
    def _():
        # Dropout(0.9) is identity in eval mode.
        g1 = jnp.maximum(acc_ref[...] + vecf_ref[1:2, :], 0.0)            # fc1 + ReLU
        zz = (jnp.sum(g1 * vecf_ref[2:3, :], axis=-1, keepdims=True)
              + vecf_ref[3:4, 0:1])                                       # fc2 (VPU dot)
        out_ref[...] = jax.nn.sigmoid(zz)


# ------------------------- one-time parameter preparation -------------------------

def prepare_gcn_params(params):
    """Fold BatchNorms + cast weights ONCE (call when weights are loaded)."""
    s1 = params["bn1_g"] * jax.lax.rsqrt(params["bn1_v"] + EPS)
    t1 = params["bn1_b"] - params["bn1_m"] * s1
    s2 = params["bn2_g"] * jax.lax.rsqrt(params["bn2_v"] + EPS)
    t2 = params["bn2_b"] - params["bn2_m"] * s2
    s3 = params["bn3_g"] * jax.lax.rsqrt(params["bn3_v"] + EPS)
    t3 = params["bn3_b"] - params["bn3_m"] * s3

    # Exact fold of BN2 into conv2: BN2(h) @ W2 = h @ W2_eff + c2.
    w2_eff = s2.reshape(-1, 1) * params["w2"]          # (512, 512)
    c2 = t2 @ params["w2"]                             # (1, 512)

    pad = lambda r: jnp.pad(r, ((0, 0), (0, HIDDEN - r.shape[1])))
    vec_full = jnp.concatenate(
        [params["b1"], params["fc1_b"], params["fc2_w"].reshape(1, HIDDEN),
         pad(params["fc2_b"]), pad(s1), pad(t1),
         jnp.zeros((2, HIDDEN), jnp.float32)], axis=0).astype(jnp.float32)   # (8, 512)
    vec_col = jnp.concatenate(
        [c2, params["b2"], s3, t3,
         jnp.zeros((4, HIDDEN), jnp.float32)], axis=0).astype(jnp.float32)   # (8, 512)

    return dict(
        w1=params["w1"].astype(jnp.bfloat16),
        w2=w2_eff.astype(jnp.bfloat16),
        fc1w=params["fc1_w"].astype(jnp.bfloat16),
        vec_full=vec_full,
        vec_col=vec_col,
    )


# ------------------------------ per-call forward ------------------------------

def _gcn_forward(x, a_hat, prep):
    n, c_in = x.shape
    grid_spec = pltpu.PrefetchScalarGridSpec(
        num_scalar_prefetch=0,
        grid=(NBLK,),
        in_specs=[
            pl.BlockSpec((n, c_in), lambda j: (0, 0)),          # x (resident)
            pl.BlockSpec((n, n), lambda j: (0, 0)),             # A_hat (resident)
            pl.BlockSpec((c_in, HIDDEN), lambda j: (0, 0)),     # W1 (resident)
            pl.BlockSpec((HIDDEN, TB), lambda j: (0, j)),       # W2_eff column block
            pl.BlockSpec((TB, HIDDEN), lambda j: (j, 0)),       # fc1_w row block
            pl.BlockSpec((8, HIDDEN), lambda j: (0, 0)),        # full-width param slab
            pl.BlockSpec((8, TB), lambda j: (0, j)),            # per-column param slab
        ],
        out_specs=pl.BlockSpec((1, 1), lambda j: (0, 0)),
        scratch_shapes=[
            pltpu.VMEM((n, HIDDEN), jnp.bfloat16),              # h = relu(conv1) (persistent)
            pltpu.VMEM((1, HIDDEN), jnp.float32),               # fc1 accumulator
        ],
    )
    return pl.pallas_call(
        _gcn_kernel,
        out_shape=jax.ShapeDtypeStruct((1, 1), jnp.float32),
        grid_spec=grid_spec,
        compiler_params=pltpu.CompilerParams(
            dimension_semantics=("arbitrary",),
            vmem_limit_bytes=16 << 20),
    )(x.astype(jnp.float32), a_hat.astype(jnp.bfloat16),
      prep["w1"], prep["w2"], prep["fc1w"], prep["vec_full"], prep["vec_col"])


gcn_forward = jax.jit(_gcn_forward)


# ------------------------- JAX glue (graph prep, params, ref) -------------------------

def build_normalized_adj(edge_index, edge_weight, num_nodes):
    """Dense GCN normalization with self-loops: A_hat = D^-1/2 (A + I) D^-1/2.

    DropEdge is expressed as zero edge weights (static shapes, jit-compatible)."""
    src, dst = edge_index[0], edge_index[1]
    adj = jnp.zeros((num_nodes, num_nodes), jnp.float32).at[dst, src].add(edge_weight)
    adj = adj + jnp.eye(num_nodes, dtype=jnp.float32)
    deg = adj.sum(axis=1)
    dinv = jnp.where(deg > 0, jax.lax.rsqrt(deg), 0.0)
    return dinv[:, None] * adj * dinv[None, :]


def init_params(key, c_in=9, hidden=HIDDEN):
    ks = jax.random.split(key, 8)

    def bn(k, c):
        k1, k2, k3, k4 = jax.random.split(k, 4)
        return dict(
            g=(1.0 + 0.1 * jax.random.normal(k1, (1, c))).astype(jnp.float32),
            b=(0.1 * jax.random.normal(k2, (1, c))).astype(jnp.float32),
            m=(0.1 * jax.random.normal(k3, (1, c))).astype(jnp.float32),
            v=(1.0 + 0.1 * jnp.abs(jax.random.normal(k4, (1, c)))).astype(jnp.float32),
        )

    def lin(k, cin, cout, scale):
        kw, kb = jax.random.split(k)
        w = (scale * jax.random.normal(kw, (cin, cout))).astype(jnp.float32)
        b = (scale * jax.random.normal(kb, (1, cout))).astype(jnp.float32)
        return w, b

    bn1, bn2, bn3 = bn(ks[0], c_in), bn(ks[1], hidden), bn(ks[2], hidden)
    w1, b1 = lin(ks[3], c_in, hidden, 0.3)
    w2, b2 = lin(ks[4], hidden, hidden, 0.05)
    fc1_w, fc1_b = lin(ks[5], hidden, hidden, 0.05)
    fc2_w, fc2_b = lin(ks[6], hidden, 1, 0.05)

    return dict(
        bn1_g=bn1["g"], bn1_b=bn1["b"], bn1_m=bn1["m"], bn1_v=bn1["v"],
        w1=w1, b1=b1,
        bn2_g=bn2["g"], bn2_b=bn2["b"], bn2_m=bn2["m"], bn2_v=bn2["v"],
        w2=w2, b2=b2,
        bn3_g=bn3["g"], bn3_b=bn3["b"], bn3_m=bn3["m"], bn3_v=bn3["v"],
        fc1_w=fc1_w, fc1_b=fc1_b,
        fc2_w=fc2_w, fc2_b=fc2_b,
    )


def reference_forward(x, a_hat, params):
    """Pure-JAX f32 reference of the eval-mode PyTorch forward pass."""
    s1 = params["bn1_g"] * jax.lax.rsqrt(params["bn1_v"] + EPS)
    t1 = params["bn1_b"] - params["bn1_m"] * s1
    s2 = params["bn2_g"] * jax.lax.rsqrt(params["bn2_v"] + EPS)
    t2 = params["bn2_b"] - params["bn2_m"] * s2
    s3 = params["bn3_g"] * jax.lax.rsqrt(params["bn3_v"] + EPS)
    t3 = params["bn3_b"] - params["bn3_m"] * s3

    h = x * s1 + t1
    h = jnp.maximum(a_hat @ (h @ params["w1"]) + params["b1"], 0.0)
    h = h * s2 + t2
    h = jnp.maximum(a_hat @ (h @ params["w2"]) + params["b2"], 0.0)
    h = h * s3 + t3
    g = jnp.max(h, axis=0, keepdims=True)
    g = jnp.maximum(g @ params["fc1_w"] + params["fc1_b"], 0.0)
    return jax.nn.sigmoid(g @ params["fc2_w"] + params["fc2_b"])


if __name__ == "__main__":
    key = jax.random.PRNGKey(0)
    k_x, k_e, k_drop, k_p = jax.random.split(key, 4)

    num_nodes, num_edges, c_in = 64, 256, 9

    x = jax.random.normal(k_x, (num_nodes, c_in), dtype=jnp.float32)
    edge_index = jax.random.randint(k_e, (2, num_edges), 0, num_nodes, dtype=jnp.int32)

    # DropEdge(p=0.2) with a fixed key, as static-shape edge-weight zeroing.
    edge_w = (jax.random.uniform(k_drop, (num_edges,)) > 0.2).astype(jnp.float32)

    a_hat = build_normalized_adj(edge_index, edge_w, num_nodes)

    params = init_params(k_p, c_in=c_in, hidden=HIDDEN)
    prep = prepare_gcn_params(params)       # one-time fold/cast, off the per-call path

    out = jax.block_until_ready(gcn_forward(x, a_hat, prep))
    ref = reference_forward(x, a_hat, params)

    assert out.shape == (1, 1), out.shape
    assert bool(jnp.all(jnp.isfinite(out)))
    assert 0.0 <= float(out[0, 0]) <= 1.0
    assert abs(float(out[0, 0]) - float(ref[0, 0])) < 5e-2, (out, ref)
    print("KERNEL_OK")
</pallas_src>

<mosaic_0001>
module attributes {stable_mosaic.version = 11 : i64} {
  func.func @_gcn_kernel(%arg0: i32, %arg1: memref<64x9xf32, #tpu.memory_space<vmem>>, %arg2: memref<64x64xbf16, #tpu.memory_space<vmem>>, %arg3: memref<9x512xbf16, #tpu.memory_space<vmem>>, %arg4: memref<512x128xbf16, #tpu.memory_space<vmem>>, %arg5: memref<128x512xbf16, #tpu.memory_space<vmem>>, %arg6: memref<8x512xf32, #tpu.memory_space<vmem>>, %arg7: memref<8x128xf32, #tpu.memory_space<vmem>>, %arg8: memref<1x1xf32, #tpu.memory_space<vmem>>, %arg9: memref<64x512xbf16, #tpu.memory_space<vmem>>, %arg10: memref<1x512xf32, #tpu.memory_space<vmem>>) attributes {dimension_semantics = [#tpu.dimension_semantics<arbitrary>], iteration_bounds = array<i64: 4>, scalar_prefetch = 0 : i64, scratch_operands = 2 : i64, tpu.core_type = #tpu.core_type<tc>, window_params = [{pipeline_mode = #tpu.pipeline_mode<synchronous>, transform_indices = @transform_0, window_bounds = array<i64: 64, 9>}, {pipeline_mode = #tpu.pipeline_mode<synchronous>, transform_indices = @transform_1, window_bounds = array<i64: 64, 64>}, {pipeline_mode = #tpu.pipeline_mode<synchronous>, transform_indices = @transform_2, window_bounds = array<i64: 9, 512>}, {transform_indices = @transform_3, window_bounds = array<i64: 512, 128>}, {transform_indices = @transform_4, window_bounds = array<i64: 128, 512>}, {pipeline_mode = #tpu.pipeline_mode<synchronous>, transform_indices = @transform_5, window_bounds = array<i64: 8, 512>}, {transform_indices = @transform_6, window_bounds = array<i64: 8, 128>}, {pipeline_mode = #tpu.pipeline_mode<synchronous>, transform_indices = @transform_7, window_bounds = array<i64: 1, 1>}]} {
    %c0 = arith.constant 0 : index
    %c0_0 = arith.constant 0 : index
    %0 = vector.load %arg2[%c0, %c0_0] : memref<64x64xbf16, #tpu.memory_space<vmem>>, vector<64x64xbf16>
    %c0_i32 = arith.constant 0 : i32
    %1 = arith.cmpi eq, %arg0, %c0_i32 : i32
    %2 = arith.extui %1 : i1 to i32
    %c0_i32_1 = arith.constant 0 : i32
    %3 = arith.cmpi ne, %2, %c0_i32_1 : i32
    scf.if %3 {
      %c0_22 = arith.constant 0 : index
      %c0_23 = arith.constant 0 : index
      %34 = vector.load %arg1[%c0_22, %c0_23] : memref<64x9xf32, #tpu.memory_space<vmem>>, vector<64x9xf32>
      %c4 = arith.constant 4 : index
      %c0_24 = arith.constant 0 : index
      %35 = vector.load %arg6[%c4, %c0_24] : memref<8x512xf32, #tpu.memory_space<vmem>>, vector<1x9xf32>
      %36 = vector.broadcast %35 : vector<1x9xf32> to vector<64x9xf32>
      %37 = arith.mulf %34, %36 : vector<64x9xf32>
      %c5 = arith.constant 5 : index
      %c0_25 = arith.constant 0 : index
      %38 = vector.load %arg6[%c5, %c0_25] : memref<8x512xf32, #tpu.memory_space<vmem>>, vector<1x9xf32>
      %39 = vector.broadcast %38 : vector<1x9xf32> to vector<64x9xf32>
      %40 = arith.addf %37, %39 : vector<64x9xf32>
      %41 = arith.truncf %40 : vector<64x9xf32> to vector<64x9xbf16>
      %cst_26 = arith.constant dense<0.000000e+00> : vector<64x9xf32>
      %42 = tpu.matmul %0, %41, %cst_26 {dimension_numbers = #tpu.dot_dimension_numbers<[1], [0], [0], [1], [0, 0, 1, 1], [], []>} : vector<64x64xbf16>, vector<64x9xbf16>, vector<64x9xf32> -> vector<64x9xf32>
      %43 = arith.truncf %42 : vector<64x9xf32> to vector<64x9xbf16>
      %c0_27 = arith.constant 0 : index
      %c0_28 = arith.constant 0 : index
      %44 = vector.load %arg3[%c0_27, %c0_28] : memref<9x512xbf16, #tpu.memory_space<vmem>>, vector<9x512xbf16>
      %cst_29 = arith.constant dense<0.000000e+00> : vector<64x512xf32>
      %45 = tpu.matmul %43, %44, %cst_29 {dimension_numbers = #tpu.dot_dimension_numbers<[1], [0], [0], [1], [0, 0, 1, 1], [], []>} : vector<64x9xbf16>, vector<9x512xbf16>, vector<64x512xf32> -> vector<64x512xf32>
      %c0_30 = arith.constant 0 : index
      %c0_31 = arith.constant 0 : index
      %46 = vector.load %arg6[%c0_30, %c0_31] : memref<8x512xf32, #tpu.memory_space<vmem>>, vector<1x512xf32>
      %47 = vector.broadcast %46 : vector<1x512xf32> to vector<64x512xf32>
      %48 = arith.addf %45, %47 : vector<64x512xf32>
      %cst_32 = arith.constant 0.000000e+00 : f32
      %49 = vector.broadcast %cst_32 : f32 to vector<64x512xf32>
      %50 = arith.maximumf %48, %49 : vector<64x512xf32>
      %51 = arith.truncf %50 : vector<64x512xf32> to vector<64x512xbf16>
      %c0_33 = arith.constant 0 : index
      %c0_34 = arith.constant 0 : index
      %52 = vector.load %arg9[%c0_33, %c0_34] : memref<64x512xbf16, #tpu.memory_space<vmem>>, vector<64x512xbf16>
      tpu.vector_store %arg9[%c0_33, %c0_34], %51 {strides = array<i32>} : memref<64x512xbf16, #tpu.memory_space<vmem>>, vector<64x512xbf16>,
      %cst_35 = arith.constant 0.000000e+00 : f32
      %53 = vector.broadcast %cst_35 : f32 to vector<1x512xf32>
      %c0_36 = arith.constant 0 : index
      %c0_37 = arith.constant 0 : index
      %54 = vector.load %arg10[%c0_36, %c0_37] : memref<1x512xf32, #tpu.memory_space<vmem>>, vector<1x512xf32>
      tpu.vector_store %arg10[%c0_36, %c0_37], %53 {strides = array<i32>} : memref<1x512xf32, #tpu.memory_space<vmem>>, vector<1x512xf32>,
    } else {
    }
    %c0_2 = arith.constant 0 : index
    %c0_3 = arith.constant 0 : index
    %4 = vector.load %arg9[%c0_2, %c0_3] : memref<64x512xbf16, #tpu.memory_space<vmem>>, vector<64x512xbf16>
    %c0_4 = arith.constant 0 : index
    %c0_5 = arith.constant 0 : index
    %5 = vector.load %arg4[%c0_4, %c0_5] : memref<512x128xbf16, #tpu.memory_space<vmem>>, vector<512x128xbf16>
    %cst = arith.constant dense<0.000000e+00> : vector<64x128xf32>
    %6 = tpu.matmul %4, %5, %cst {dimension_numbers = #tpu.dot_dimension_numbers<[1], [0], [0], [1], [0, 0, 1, 1], [], []>} : vector<64x512xbf16>, vector<512x128xbf16>, vector<64x128xf32> -> vector<64x128xf32>
    %c0_6 = arith.constant 0 : index
    %c0_7 = arith.constant 0 : index
    %7 = vector.load %arg7[%c0_6, %c0_7] : memref<8x128xf32, #tpu.memory_space<vmem>>, vector<1x128xf32>
    %8 = vector.broadcast %7 : vector<1x128xf32> to vector<64x128xf32>
    %9 = arith.addf %6, %8 : vector<64x128xf32>
    %10 = arith.truncf %9 : vector<64x128xf32> to vector<64x128xbf16>
    %cst_8 = arith.constant dense<0.000000e+00> : vector<64x128xf32>
    %11 = tpu.matmul %0, %10, %cst_8 {dimension_numbers = #tpu.dot_dimension_numbers<[1], [0], [0], [1], [0, 0, 1, 1], [], []>} : vector<64x64xbf16>, vector<64x128xbf16>, vector<64x128xf32> -> vector<64x128xf32>
    %c1 = arith.constant 1 : index
    %c0_9 = arith.constant 0 : index
    %12 = vector.load %arg7[%c1, %c0_9] : memref<8x128xf32, #tpu.memory_space<vmem>>, vector<1x128xf32>
    %13 = vector.broadcast %12 : vector<1x128xf32> to vector<64x128xf32>
    %14 = arith.addf %11, %13 : vector<64x128xf32>
    %cst_10 = arith.constant 0.000000e+00 : f32
    %15 = vector.broadcast %cst_10 : f32 to vector<64x128xf32>
    %16 = arith.maximumf %14, %15 : vector<64x128xf32>
    %c2 = arith.constant 2 : index
    %c0_11 = arith.constant 0 : index
    %17 = vector.load %arg7[%c2, %c0_11] : memref<8x128xf32, #tpu.memory_space<vmem>>, vector<1x128xf32>
    %18 = vector.broadcast %17 : vector<1x128xf32> to vector<64x128xf32>
    %19 = arith.mulf %16, %18 : vector<64x128xf32>
    %c3 = arith.constant 3 : index
    %c0_12 = arith.constant 0 : index
    %20 = vector.load %arg7[%c3, %c0_12] : memref<8x128xf32, #tpu.memory_space<vmem>>, vector<1x128xf32>
    %21 = vector.broadcast %20 : vector<1x128xf32> to vector<64x128xf32>
    %22 = arith.addf %19, %21 : vector<64x128xf32>
    %cst_13 = arith.constant dense<0xFF800000> : vector<128xf32>
    %23 = vector.multi_reduction <maximumf>, %22, %cst_13 [0] : vector<64x128xf32> to vector<128xf32>
    %24 = vector.shape_cast %23 : vector<128xf32> to vector<1x128xf32>
    %c0_14 = arith.constant 0 : index
    %c0_15 = arith.constant 0 : index
    %25 = vector.load %arg10[%c0_14, %c0_15] : memref<1x512xf32, #tpu.memory_space<vmem>>, vector<1x512xf32>
    %26 = arith.truncf %24 : vector<1x128xf32> to vector<1x128xbf16>
    %c0_16 = arith.constant 0 : index
    %c0_17 = arith.constant 0 : index
    %27 = vector.load %arg5[%c0_16, %c0_17] : memref<128x512xbf16, #tpu.memory_space<vmem>>, vector<128x512xbf16>
    %cst_18 = arith.constant dense<0.000000e+00> : vector<1x512xf32>
    %28 = tpu.matmul %26, %27, %cst_18 {dimension_numbers = #tpu.dot_dimension_numbers<[1], [0], [0], [1], [0, 0, 1, 1], [], []>} : vector<1x128xbf16>, vector<128x512xbf16>, vector<1x512xf32> -> vector<1x512xf32>
    %29 = arith.addf %25, %28 : vector<1x512xf32>
    %c0_19 = arith.constant 0 : index
    %c0_20 = arith.constant 0 : index
    %30 = vector.load %arg10[%c0_19, %c0_20] : memref<1x512xf32, #tpu.memory_space<vmem>>, vector<1x512xf32>
    tpu.vector_store %arg10[%c0_19, %c0_20], %29 {strides = array<i32>} : memref<1x512xf32, #tpu.memory_space<vmem>>, vector<1x512xf32>,
    %c3_i32 = arith.constant 3 : i32
    %31 = arith.cmpi eq, %arg0, %c3_i32 : i32
    %32 = arith.extui %31 : i1 to i32
    %c0_i32_21 = arith.constant 0 : i32
    %33 = arith.cmpi ne, %32, %c0_i32_21 : i32
    scf.if %33 {
      %c0_22 = arith.constant 0 : index
      %c0_23 = arith.constant 0 : index
      %34 = vector.load %arg10[%c0_22, %c0_23] : memref<1x512xf32, #tpu.memory_space<vmem>>, vector<1x512xf32>
      %c1_24 = arith.constant 1 : index
      %c0_25 = arith.constant 0 : index
      %35 = vector.load %arg6[%c1_24, %c0_25] : memref<8x512xf32, #tpu.memory_space<vmem>>, vector<1x512xf32>
      %36 = arith.addf %34, %35 : vector<1x512xf32>
      %cst_26 = arith.constant 0.000000e+00 : f32
      %37 = vector.broadcast %cst_26 : f32 to vector<1x512xf32>
      %38 = arith.maximumf %36, %37 : vector<1x512xf32>
      %c2_27 = arith.constant 2 : index
      %c0_28 = arith.constant 0 : index
      %39 = vector.load %arg6[%c2_27, %c0_28] : memref<8x512xf32, #tpu.memory_space<vmem>>, vector<1x512xf32>
      %40 = arith.mulf %38, %39 : vector<1x512xf32>
      %cst_29 = arith.constant dense<0.000000e+00> : vector<1xf32>
      %41 = vector.multi_reduction <add>, %40, %cst_29 [1] : vector<1x512xf32> to vector<1xf32>
      %42 = vector.shape_cast %41 : vector<1xf32> to vector<1x1xf32>
      %c3_30 = arith.constant 3 : index
      %c0_31 = arith.constant 0 : index
      %43 = vector.load %arg6[%c3_30, %c0_31] : memref<8x512xf32, #tpu.memory_space<vmem>>, vector<1x1xf32>
      %44 = arith.addf %42, %43 : vector<1x1xf32>
      %45 = arith.negf %44 : vector<1x1xf32>
      %46 = math.exp %45 : vector<1x1xf32>
      %cst_32 = arith.constant 1.000000e+00 : f32
      %47 = vector.broadcast %cst_32 : f32 to vector<1x1xf32>
      %48 = arith.addf %47, %46 : vector<1x1xf32>
      %49 = arith.divf %47, %48 : vector<1x1xf32>
      %c0_33 = arith.constant 0 : index
      %c0_34 = arith.constant 0 : index
      %50 = vector.load %arg8[%c0_33, %c0_34] : memref<1x1xf32, #tpu.memory_space<vmem>>, vector<1x1xf32>
      tpu.vector_store %arg8[%c0_33, %c0_34], %49 {strides = array<i32>} : memref<1x1xf32, #tpu.memory_space<vmem>>, vector<1x1xf32>,
    } else {
    }
    return
  }
  func.func @transform_0(%arg0: i32) -> (i32, i32) {
    %c0_i32 = arith.constant 0 : i32
    %c0_i32_0 = arith.constant 0 : i32
    %c0_i32_1 = arith.constant 0 : i32
    return %c0_i32, %c0_i32_0 : i32, i32
  }
  func.func @transform_1(%arg0: i32) -> (i32, i32) {
    %c0_i32 = arith.constant 0 : i32
    %c0_i32_0 = arith.constant 0 : i32
    %c0_i32_1 = arith.constant 0 : i32
    return %c0_i32, %c0_i32_0 : i32, i32
  }
  func.func @transform_2(%arg0: i32) -> (i32, i32) {
    %c0_i32 = arith.constant 0 : i32
    %c0_i32_0 = arith.constant 0 : i32
    %c0_i32_1 = arith.constant 0 : i32
    return %c0_i32, %c0_i32_0 : i32, i32
  }
  func.func @transform_3(%arg0: i32) -> (i32, i32) {
    %c0_i32 = arith.constant 0 : i32
    %c0_i32_0 = arith.constant 0 : i32
    return %c0_i32, %arg0 : i32, i32
  }
  func.func @transform_4(%arg0: i32) -> (i32, i32) {
    %c0_i32 = arith.constant 0 : i32
    %c0_i32_0 = arith.constant 0 : i32
    return %arg0, %c0_i32 : i32, i32
  }
  func.func @transform_5(%arg0: i32) -> (i32, i32) {
    %c0_i32 = arith.constant 0 : i32
    %c0_i32_0 = arith.constant 0 : i32
    %c0_i32_1 = arith.constant 0 : i32
    return %c0_i32, %c0_i32_0 : i32, i32
  }
  func.func @transform_6(%arg0: i32) -> (i32, i32) {
    %c0_i32 = arith.constant 0 : i32
    %c0_i32_0 = arith.constant 0 : i32
    return %c0_i32, %arg0 : i32, i32
  }
  func.func @transform_7(%arg0: i32) -> (i32, i32) {
    %c0_i32 = arith.constant 0 : i32
    %c0_i32_0 = arith.constant 0 : i32
    %c0_i32_1 = arith.constant 0 : i32
    return %c0_i32, %c0_i32_0 : i32, i32
  }
}

</mosaic_0001>

<bundles_post_ra>
// kernel: _gcn_forward.1
= control target key start
LH: loop header
LB: loop body
LE: loop exit
PB: predicated region body
PF: predicated region fallthrough
CT: control target
= control target key end

     0   :  { %12 = vsyncpa [#allocation5], 0  ;;  %s2814_s0 = inlined_call_operand.vmem [shape: f32[64,9], index: 0, kind: input, shape index: {}]   ;;  %s2815_s1 = inlined_call_operand.vmem [shape: bf16[64,64], index: 1, kind: input, shape index: {}]   ;;  %s2816_s2 = inlined_call_operand.vmem [shape: bf16[9,512], index: 2, kind: input, shape index: {}]   ;;  %s2817_s3 = inlined_call_operand.hbm [shape: bf16[512,512], index: 3, kind: input, shape index: {}]   ;;  %s2818_s4 = inlined_call_operand.hbm [shape: bf16[512,512], index: 4, kind: input, shape index: {}]   ;;  %s2819_s5 = inlined_call_operand.vmem [shape: f32[8,512], index: 5, kind: input, shape index: {}]   ;;  %s2820_s6 = inlined_call_operand.vmem [shape: f32[8,512], index: 6, kind: input, shape index: {}]   ;;  %s2821_s7 = inlined_call_operand.hbm [shape: f32[1,1], index: 7, kind: output, shape index: {}]  }
   0x1   :  { %14 = vsyncpa [#allocation5 + $0x1], 0 }
   0x2   :  { %15 = vsyncpa [#allocation8], 0 }
   0x3   :  { %17 = vsyncpa [#allocation8 + $0x1], 0 }
   0x4   :  { %18 = vsyncpa [#allocation6], 0  ;;  %s2379_s24 = smov 0   ;;  %s2381_s25 = smov 0  }
   0x5   :  { %s2383_s26 = smov 0   ;;  %s2385_s27 = smov 0  }
   0x6 LB: > { %s2398_s28 = sadd.s32 4294967295, %s2325_s27   ;;  %s2401_s29 = sadd.s32 1, %s2325_s27   ;;  %s2325_s27 = sphi %s2385_s27, %s2830_s27   ;;  %s2321_s26 = sphi %s2383_s26, %s2829_s26   ;;  %s2317_s25 = sphi %s2381_s25, %s2828_s25   ;;  %s2313_s24 = sphi %s2379_s24, %s2827_s24  }
   0x7   : > { %s91_s30 = ssub.s32 %s2325_s27, %s2401_s29  ;;  %s94_s8 = sadd.s32 1, %s2321_s26 }
   0x8   : > { %p92_p0 = scmp.eq.s32.totalorder %s91_s30, 0  ;;  %p101_p1 = scmp.ne.s32.totalorder %s2321_s26, %s2317_s25 }
   0x9   : > { %p102_p2 = scmp.eq.s32.totalorder %s2325_s27, 0  ;;  %p107_p3 = scmp.ne.s32.totalorder %s2317_s25, %s2313_s24 }
   0xa   : > { %s2411_s9 = scalar_select %p92_p0, %s2321_s26, %s94_s8  }
   0xb   : > { %p103_p4 = por %p102_p2, %p101_p1  ;;  %p108_p5 = scmp.eq.s32.totalorder %s2398_s28, 0 }
   0xc   : > { %p2062_p6 = scmp.lt.s32.totalorder %s2325_s27, 4  ;;  %s2420_s11 = sand.u32 1, %s2321_s26  }
   0xd   : > { %p2415_p7 = por %p108_p5, %p107_p3  ;;  %s1794_s12 = sshll.u32 %s2420_s11, 8 }
   0xe   : > { %s1795_s13 = sshll.u32 %s2325_s27, 6  ;;  %s241_s17 = scalar_lea.vmem [#allocation4], %s1794_s12 }
   0xf   : > { %s2823_s10 = scalar_select %p2415_p7, 1, 0 }
  0x10   : > { %s2427_s16 = scalar_lea.hbm %s2817_s3, %s1795_s13  ;;  %s247_s18 = sshll.u32 %s241_s17, 4  ;;  %s2431_s18 = int_to_ptr.vmem [resolvable:$true] %s247_s18 }
  0x11   : > { %p2433_p8 = pnand %p2062_p6, %p103_p4  ;;  %s238_s20 = scalar_lea.sflag [#allocation5], %s2420_s11 }
  0x12   : > { %s2197_s21 = scalar_lea.hbm %s2427_s16, 4096  ;;  %s2202_s24 = scalar_lea.hbm %s2817_s3, 16384 }
  0x13   : > { %p2198_p9 = scmp.ne.s32.totalorder %s2427_s16, %s2197_s21  ;;  %p2199_p10 = pneg %p2433_p8 }
  0x14   : > { %p2203_p13 = scmp.lt.u32.totalorder %s2427_s16, %s2817_s3  ;;  %p2204_p0 = scmp.lt.u32.totalorder %s2202_s24, %s2197_s21 }
  0x15   : > { %p2200_p11 = pnand %p2199_p10, %p2198_p9  ;;  %p2206_p2 = scmp.lt.u32.totalorder %s2197_s21, %s2427_s16 }
  0x16   : > { %p2205_p1 = por %p2204_p0, %p2203_p13 }
  0x17   : > { %p2201_p12 = pneg %p2200_p11 }
  0x18   : > { %p2207_p3 = por %p2206_p2, %p2205_p1 }
  0x1a   : > { %p2208_p4 = pnand %p2207_p3, %p2201_p12 }
  0x1c   : > { %2211 = shalt.err (!%p2208_p4)
}
  0x1d   : > { %s2212_s13 = scalar_lea.vmem %s2431_s18, 4096  ;;  %s2327_s14 = smov [#allocation4]  }
  0x1e   : > { %p2213_p5 = scmp.ne.s32.totalorder %s2431_s18, %s2212_s13  ;;  %s2217_s15 = sshll.u32 %s2327_s14, 4  ;;  %s2218_s15 = int_to_ptr.vmem [resolvable:$false] %s2217_s15 }
  0x1f   : > { %s2219_s17 = scalar_lea.vmem %s2218_s15, 8192  ;;  %p2220_p11 = scmp.lt.s32.totalorder %s2431_s18, %s2218_s15 }
  0x20   : > { %p2215_p6 = pnand %p2213_p5, %p2199_p10  ;;  %p2221_p13 = scmp.lt.s32.totalorder %s2219_s17, %s2212_s13 }
  0x22   : > { %p2216_p9 = pneg %p2215_p6  ;;  %p2222_p0 = por %p2221_p13, %p2220_p11 }
  0x24   : > { %p2223_p1 = pnand %p2222_p0, %p2216_p9 }
  0x26   : > { %2226 = shalt.err (!%p2223_p1)
}
  0x27   : > { %s2328_s21 = smov 256   ;;  %s2329_s22 = smov 64  }
  0x28   : > { %s2330_s23 = smov 4   ;;  %p1800_p12 = scmp.ge.s32.totalorder %s2325_s27, 1 }
  0x29   : > { %2058 = dma.hbm_to_vmem [thread:$0]  (!%p2433_p8), %s2427_s16, 4096, %s2431_s18, %s238_s20, %s2328_s21, %s2329_s22, %s2330_s23  }
  0x2a   : > { %p284_p2 = scmp.lt.s32.totalorder %s2325_s27, 5  ;;  %s1910_s30 = sshll.u32 %s2325_s27, 12 }
  0x2b   : > { %s2476_s14 = scalar_lea.hbm %s2818_s4, %s1910_s30  ;;  %s261_s15 = scalar_lea.vmem [#allocation7], %s1794_s12 }
  0x2c   : > { %p2468_p3 = pnand %p1800_p12, %p284_p2  ;;  %s269_s17 = sshll.u32 %s261_s15, 4  ;;  %s2480_s17 = int_to_ptr.vmem [resolvable:$true] %s269_s17 }
  0x2d   : > { %s258_s16 = scalar_lea.sflag [#allocation8], %s2420_s11  ;;  %s2227_s18 = scalar_lea.hbm %s2476_s14, 4096 }
  0x2e   : > { %p2228_p4 = scmp.ne.s32.totalorder %s2476_s14, %s2227_s18  ;;  %s2232_s22 = scalar_lea.hbm %s2818_s4, 16384 }
  0x2f   : > { %p2233_p9 = scmp.lt.u32.totalorder %s2476_s14, %s2818_s4  ;;  %p2234_p11 = scmp.lt.u32.totalorder %s2232_s22, %s2227_s18 }
  0x30   : > { %p2230_p5 = pnand %p2228_p4, %p2199_p10  ;;  %p2236_p0 = scmp.lt.u32.totalorder %s2227_s18, %s2476_s14 }
  0x31   : > { %p2235_p13 = por %p2234_p11, %p2233_p9 }
  0x32   : > { %p2231_p6 = pneg %p2230_p5 }
  0x33   : > { %p2237_p1 = por %p2236_p0, %p2235_p13 }
  0x35   : > { %p2238_p12 = pnand %p2237_p1, %p2231_p6 }
  0x37   : > { %2241 = shalt.err (!%p2238_p12)
}
  0x38   : > { %s2242_s12 = scalar_lea.vmem %s2480_s17, 4096  ;;  %s2331_s8 = smov [#allocation7]  }
  0x39   : > { %p2243_p2 = scmp.ne.s32.totalorder %s2480_s17, %s2242_s12  ;;  %s2247_s13 = sshll.u32 %s2331_s8, 4  ;;  %s2248_s13 = int_to_ptr.vmem [resolvable:$false] %s2247_s13 }
  0x3a   : > { %s2249_s15 = scalar_lea.vmem %s2248_s13, 8192  ;;  %p2250_p7 = scmp.lt.s32.totalorder %s2480_s17, %s2248_s13 }
  0x3b   : > { %p2245_p4 = pnand %p2243_p2, %p2199_p10  ;;  %p2251_p9 = scmp.lt.s32.totalorder %s2249_s15, %s2242_s12 }
  0x3d   : > { %p2246_p5 = pneg %p2245_p4  ;;  %p2252_p11 = por %p2251_p9, %p2250_p7 }
  0x3f   : > { %p2253_p13 = pnand %p2252_p11, %p2246_p5 }
  0x41   : > { %2256 = shalt.err (!%p2253_p13)
}
  0x42   : > { %s2332_s18 = smov 16   ;;  %288 = sbr.rel (%p2468_p3) target bundleno = 1545 (0x609), region = 48 }
  0x43   : > { %2061 = dma.hbm_to_vmem [thread:$0]  (!%p2433_p8), %s2476_s14, 4096, %s2480_s17, %s258_s16, %s2328_s21, %s2328_s21, %s2332_s18  }
  0x44   : > { %s290_s27 = sand.u32 (!%p2468_p3), 1, %s2317_s25   ;;  %p2826_p7 = scmp.ne.s32.totalorder (!%p2468_p3), %s2823_s10, 0 }
  0x45   : > { %s1801_s20 = sshll.u32 (!%p2468_p3), %s290_s27, 8  ;;  %s291_s22 = scalar_lea.sflag (!%p2468_p3), [#allocation5], %s290_s27 }
  0x46   : > { %s2513_s23 = scalar_lea.vmem (!%p2468_p3), [#allocation4], %s1801_s20 }
  0x49   : > { %2300 = dma.done.wait (%p2826_p7), %s291_s22, 4096  }
  0x4a   : > { %2302 = vsyncadd (%p2826_p7), %s291_s22, 4294963200  ;;  %s300_s11 = scalar_lea.sflag [#allocation8], %s290_s27  ;;  %s2519_s19 = scalar_lea.vmem [#allocation7], %s1801_s20 }
  0x4b   : > { %2304 = dma.done.wait (%p2826_p7), %s300_s11, 4096  }
  0x4c   : > { %2306 = vsyncadd (%p2826_p7), %s300_s11, 4294963200  ;;  %p339_p8 = scmp.lt.s32.totalorder %s2398_s28, 3  ;;  %v2535_v0 = vld [vmem:[%s2815_s1] sm:$0xf]  ;;  %v2540_v1 = vld [vmem:[%s2815_s1 + $0x4] sm:$0xf] }
  0x4d   : > { %v2545_v2 = vld [vmem:[%s2815_s1 + $0x8] sm:$0xf]  ;;  %v2550_v3 = vld [vmem:[%s2815_s1 + $0xc] sm:$0xf]  ;;  %v2555_v4 = vld [vmem:[%s2815_s1 + $0x10] sm:$0xf] }
  0x4e   : > { %s340_s21 = scalar_select %p339_p8, %s2398_s28, 3  ;;  %v2560_v5 = vld [vmem:[%s2815_s1 + $0x14] sm:$0xf]  ;;  %v2565_v6 = vld [vmem:[%s2815_s1 + $0x18] sm:$0xf] }
  0x4f   : > { %v2570_v7 = vld [vmem:[%s2815_s1 + $0x1c] sm:$0xf]  ;;  %p1804_p10 = scmp.ne.s32.totalorder %s2398_s28, 0 }
  0x50   : > { %s1803_s24 = sshll.u32 %s340_s21, 3  ;;  %v356_v8 = vld [vmem:[%s2814_s0] sm:$0xff] (!%p1804_p10)  ;;  %v357_v9 = vld [vmem:[%s2814_s0 + $0x8] sm:$0xff] (!%p1804_p10)  ;;  %v1805_v11 = vcombine.low (!%p1804_p10), %v2535_v0, %v2540_v1  ;;  %vm406_vm0 = vcmask (!%p1804_p10), 523264   ;;  %v1807_v12 = vcombine.low (!%p1804_p10), %v2555_v4, %v2560_v5  ;;  %v358_v16 = vld [vmem:[%s2814_s0 + $0x10] sm:$0xff] (!%p1804_p10)  ;;  %vm543_vm1 = vcmask (!%p1804_p10), 1043456  }
  0x51   : > { %s2530_s16 = scalar_lea.vmem %s2820_s6, %s1803_s24  ;;  %355 = sbr.rel (%p1804_p10) target bundleno = 567 (0x237), region = 60  ;;  %v364_v10 = vld [vmem:[%s2819_s5 + $0x4] ss:$0 sm:$0xff] (!%p1804_p10)  ;;  %v373_v15 = vld [vmem:[%s2819_s5 + $0x5] ss:$0 sm:$0xff] (!%p1804_p10)  ;;  %v359_v17 = vld [vmem:[%s2814_s0 + $0x18] sm:$0xff] (!%p1804_p10)  ;;  %v1806_v49 = vcombine.low (!%p1804_p10), %v2545_v2, %v2550_v3  ;;  %v1808_v50 = vcombine.low (!%p1804_p10), %v2565_v6, %v2570_v7 }
  0x52   : > { %v365_v13 = vmul.f32 (!%p1804_p10), %v364_v10, %v356_v8  ;;  %v366_v14 = vmul.f32 (!%p1804_p10), %v364_v10, %v357_v9  ;;  %v367_v18 = vmul.f32 (!%p1804_p10), %v364_v10, %v358_v16  ;;  %v368_v19 = vmul.f32 (!%p1804_p10), %v364_v10, %v359_v17  ;;  %v360_v20 = vld [vmem:[%s2814_s0 + $0x20] sm:$0xff] (!%p1804_p10)  ;;  %v361_v21 = vld [vmem:[%s2814_s0 + $0x28] sm:$0xff] (!%p1804_p10)  ;;  %v362_v22 = vld [vmem:[%s2814_s0 + $0x30] sm:$0xff] (!%p1804_p10)  ;;  %2015 = vmatprep.mubr.msk.bf16.mxu0 (!%p1804_p10), %vm406_vm0, %v1805_v11 }
  0x53   : > { %2019 = vmatprep.mubr.msk.bf16.mxu1 (!%p1804_p10), %vm406_vm0, %v1807_v12  ;;  %v369_v25 = vmul.f32 (!%p1804_p10), %v364_v10, %v360_v20  ;;  %v370_v26 = vmul.f32 (!%p1804_p10), %v364_v10, %v361_v21  ;;  %v363_v27 = vld [vmem:[%s2814_s0 + $0x38] sm:$0xff] (!%p1804_p10)  ;;  %v371_v30 = vmul.f32 (!%p1804_p10), %v364_v10, %v362_v22  ;;  %vm544_vm2 = vcmask (!%p1804_p10), 1044480   ;;  %v2109_v42 = vld [vmem:[%s2816_s2 + $0x4] ss:$16 sps:$4 sm:$0x1f] (!%p1804_p10)  }
  0x54   : > { %v374_v23 = vadd.f32 (!%p1804_p10), %v373_v15, %v365_v13  ;;  %v375_v24 = vadd.f32 (!%p1804_p10), %v373_v15, %v366_v14  ;;  %v376_v28 = vadd.f32 (!%p1804_p10), %v373_v15, %v367_v18  ;;  %v377_v29 = vadd.f32 (!%p1804_p10), %v373_v15, %v368_v19  ;;  %v2112_v43 = vld [vmem:[%s2816_s2 + $0xc] ss:$16 sps:$4 sm:$0x1f] (!%p1804_p10)   ;;  %v2107_v45 = vld [vmem:[%s2816_s2] ss:$16 sps:$4 sm:$0x1f] (!%p1804_p10)  }
  0x55   : > { %v378_v32 = vadd.f32 (!%p1804_p10), %v373_v15, %v369_v25  ;;  %v379_v33 = vadd.f32 (!%p1804_p10), %v373_v15, %v370_v26  ;;  %v372_v34 = vmul.f32 (!%p1804_p10), %v364_v10, %v363_v27  ;;  %v380_v37 = vadd.f32 (!%p1804_p10), %v373_v15, %v371_v30  ;;  %v2110_v46 = vld [vmem:[%s2816_s2 + $0x8] ss:$16 sps:$4 sm:$0x1f] (!%p1804_p10)  }
  0x56   : > { %v382_v31 = vpack.c.bf16 (!%p1804_p10), %v375_v24, %v374_v23  ;;  %v383_v35 = vpack.c.bf16 (!%p1804_p10), %v377_v29, %v376_v28  ;;  %v2333_v39 = vmov (!%p1804_p10), 65535   ;;  %v2334_v53 = vmov (!%p1804_p10), 0  }
  0x57   : > { %v384_v36 = vpack.c.bf16 (!%p1804_p10), %v379_v33, %v378_v32  ;;  %v381_v38 = vadd.f32 (!%p1804_p10), %v373_v15, %v372_v34  ;;  %v545_v40 = vsel (!%p1804_p10), %vm543_vm1, 4294967295, %v2333_v39  ;;  %vm530_vm3 = vcmask (!%p1804_p10), 72704   ;;  %v492_v15 = vld [vmem:[%s2819_s5] ss:$8 sm:$0xf] (!%p1804_p10) }
  0x58   : > { %2007 = vmatprep.subr.bf16.mxu0 %v382_v31  ;;  %2039 = vmatprep.subr.bf16.mxu1 %v382_v31  ;;  %v546_v44 = vsel %vm544_vm2, %v545_v40, 0  ;;  %v494_v10 = vlaneseq  ;;  %v2335_v11 = vmov 0.0  }
  0x59   : > { %2008 = vmatpush3.bf16.msra.mxu0 %v382_v31  ;;  %2043 = vmatpush3.bf16.msra.mxu1 %v382_v31  ;;  %v385_v41 = vpack.c.bf16 %v381_v38, %v380_v37  ;;  %v551_v47 = vand.u32 %v2109_v42, %v546_v44  ;;  %v557_v48 = vand.u32 %v2112_v43, %v546_v44 }
  0x5a   : > { %2009 = vmatprep.subr.bf16.mxu0 %v383_v35  ;;  %2040 = vmatprep.subr.bf16.mxu1 %v383_v35  ;;  %v548_v51 = vand.u32 %v2107_v45, %v546_v44  ;;  %v554_v52 = vand.u32 %v2110_v46, %v546_v44  ;;  %vm771_vm4 = vcmp.lt.s32.totalorder %v494_v10, 512  ;;  %v495_v12 = vshrl.u32 %v494_v10, 7 }
  0x5b   : > { %773 = vst.msk [vmem:[#allocation3] sm:$0xf] %vm771_vm4, %v2335_v11 }
  0x5c   : > { %v496_v13 = vsub.s32 0, %v495_v12  ;;  %v504_v14 = vsub.s32 2, %v495_v12  ;;  %v500_v16 = vsub.s32 1, %v495_v12  ;;  %v508_v17 = vsub.s32 3, %v495_v12 }
  0x5d   : > { %2010 = vmatpush3.bf16.msra.mxu0 %v383_v35  ;;  %2044 = vmatpush3.bf16.msra.mxu1 %v383_v35 }
  0x5e   : > { %2011 = vmatprep.subr.bf16.mxu0 %v384_v36  ;;  %2041 = vmatprep.subr.bf16.mxu1 %v384_v36  ;;  %v2638_v18 = vrot.slane %v492_v15, %v496_v13  ;;  %v2640_v19 = vrot.slane %v492_v15, %v504_v14  ;;  %v2642_v20 = vrot.slane %v492_v15, %v500_v16 }
  0x5f   : > { %v2644_v21 = vrot.slane %v492_v15, %v508_v17 }
  0x61   : > { %2012 = vmatpush3.bf16.msra.mxu0 %v384_v36  ;;  %2045 = vmatpush3.bf16.msra.mxu1 %v384_v36 }
  0x62   : > { %2013 = vmatprep.subr.bf16.mxu0 %v385_v41  ;;  %2042 = vmatprep.subr.bf16.mxu1 %v385_v41 }
  0x65   : > { %2014 = vmatpush3.bf16.msra.mxu0 %v385_v41  ;;  %2046 = vmatpush3.bf16.msra.mxu1 %v385_v41 }
  0x66   : > { %559 = vmatprep.subr.bf16.mxu1 %v551_v47  ;;  %632 = vmatprep.subr.bf16.mxu0 %v557_v48 }
  0x68   : > { %2016 = vmatmul.mubr.msk.bf16.vlgmr.msra.gmra.mrb[0].mxu0 %vm406_vm0, %v1806_v49  ;;  %2020 = vmatmul.mubr.msk.bf16.vlgmr.msra.gmra.mrb[0].mxu1 %vm406_vm0, %v1808_v50 }
  0x69   : > { %560 = vmatpush1.bf16.msra.mxu1 %v548_v51  ;;  %633 = vmatpush1.bf16.msra.mxu0 %v554_v52 }
  0x6a   : > { %591 = vmatprep.mubr.bf16.mxu1 %v2334_v53  ;;  %664 = vmatprep.mubr.bf16.mxu0 %v2334_v53 }
 0x13b   : > { %v2017_v54 = vpop.f32.mrb[0].mxu0  ;;  %v2021_v55 = vpop.f32.mrb[0].mxu1 }
 0x13c   : > { %v453_v56 = vpop.f32.mrb[1].mxu0  ;;  %v469_v57 = vpop.f32.mrb[1].mxu1 }
 0x13d   : > { %v2018_v58 = vpop.f32.mrb[2].mxu0  ;;  %v2022_v59 = vpop.f32.mrb[2].mxu1 }
 0x13e   : > { %v485_v60 = vpack.c.bf16 %v2018_v58, %v2017_v54  ;;  %v456_v61 = vpop.f32.mrb[3].mxu0  ;;  %v487_v62 = vpack.c.bf16 %v2022_v59, %v2021_v55  ;;  %v472_v63 = vpop.f32.mrb[3].mxu1 }
 0x13f   : > { %v484_v8 = vpack.c.bf16 %v456_v61, %v453_v56  ;;  %v486_v9 = vpack.c.bf16 %v472_v63, %v469_v57 }
 0x141   : > { %1817 = vmatmul.mubr.msk.bf16.vlgmr.msra.gmra.mrb[4].mxu1 %vm530_vm3, %v484_v8  ;;  %1821 = vmatmul.mubr.msk.bf16.vlgmr.msra.gmra.mrb[4].mxu0 %vm530_vm3, %v484_v8 }
 0x142   : > { %601 = vmatprep.mubr.bf16.mxu1 %v2334_v53  ;;  %674 = vmatprep.mubr.bf16.mxu0 %v2334_v53 }
 0x149   : > { %1818 = vmatmul.mubr.msk.bf16.gmra.mrb[8].mxu1 %vm530_vm3, %v485_v60  ;;  %1822 = vmatmul.mubr.msk.bf16.gmra.mrb[8].mxu0 %vm530_vm3, %v485_v60 }
 0x14a   : > { %611 = vmatprep.mubr.bf16.mxu1 %v2334_v53  ;;  %684 = vmatprep.mubr.bf16.mxu0 %v2334_v53 }
 0x151   : > { %1819 = vmatmul.mubr.msk.bf16.gmra.mrb[12].mxu1 %vm530_vm3, %v486_v9  ;;  %1823 = vmatmul.mubr.msk.bf16.gmra.mrb[12].mxu0 %vm530_vm3, %v486_v9 }
 0x152   : > { %621 = vmatprep.mubr.bf16.mxu1 %v2334_v53  ;;  %694 = vmatprep.mubr.bf16.mxu0 %v2334_v53 }
 0x159   : > { %1820 = vmatmul.mubr.msk.bf16.gmra.mrb[16].mxu1 %vm530_vm3, %v487_v62  ;;  %1824 = vmatmul.mubr.msk.bf16.gmra.mrb[16].mxu0 %vm530_vm3, %v487_v62 }
 0x214   : > { %v593_v22 = vpop.f32.mrb[4].mxu1  ;;  %v666_v23 = vpop.f32.mrb[4].mxu0 }
 0x215   : > { %v594_v24 = vadd.f32 %v593_v22, %v2638_v18  ;;  %v667_v25 = vadd.f32 %v666_v23, %v2640_v19  ;;  %v595_v26 = vpop.f32.mrb[5].mxu1  ;;  %v668_v27 = vpop.f32.mrb[5].mxu0 }
 0x216   : > { %v596_v28 = vadd.f32 %v595_v26, %v2642_v20  ;;  %v669_v29 = vadd.f32 %v668_v27, %v2644_v21  ;;  %v597_v30 = vpop.f32.mrb[6].mxu1  ;;  %v670_v31 = vpop.f32.mrb[6].mxu0 }
 0x217   : > { %v598_v32 = vadd.f32 %v597_v30, %v2638_v18  ;;  %v671_v33 = vadd.f32 %v670_v31, %v2640_v19  ;;  %v599_v34 = vpop.f32.mrb[7].mxu1  ;;  %v672_v35 = vpop.f32.mrb[7].mxu0  ;;  %v705_v38 = vmax.f32 %v594_v24, 0.0  ;;  %v707_v39 = vmax.f32 %v667_v25, 0.0 }
 0x218   : > { %v600_v36 = vadd.f32 %v599_v34, %v2642_v20  ;;  %v673_v37 = vadd.f32 %v672_v35, %v2644_v21  ;;  %v706_v42 = vmax.f32 %v596_v28, 0.0  ;;  %v708_v43 = vmax.f32 %v669_v29, 0.0 }
 0x219   : > { %v709_v40 = vmax.f32 %v598_v32, 0.0  ;;  %v711_v41 = vmax.f32 %v671_v33, 0.0 }
 0x21a   : > { %v710_v44 = vmax.f32 %v600_v36, 0.0  ;;  %v712_v45 = vmax.f32 %v673_v37, 0.0 }
 0x21b   : > { %v737_v46 = vpack.c.bf16 %v709_v40, %v705_v38  ;;  %v739_v47 = vpack.c.bf16 %v711_v41, %v707_v39 }
 0x21c   : > { %v738_v48 = vpack.c.bf16 %v710_v44, %v706_v42  ;;  %v740_v49 = vpack.c.bf16 %v712_v45, %v708_v43  ;;  %v603_v50 = vpop.f32.mrb[8].mxu1  ;;  %v676_v51 = vpop.f32.mrb[8].mxu0 }
 0x21d   : > { %753 = vst [vmem:[#allocation2] sm:$0xff] %v737_v46  ;;  %755 = vst [vmem:[#allocation2 + $0x10] sm:$0xff] %v739_v47  ;;  %v604_v52 = vadd.f32 %v603_v50, %v2638_v18  ;;  %v677_v53 = vadd.f32 %v676_v51, %v2640_v19  ;;  %v605_v54 = vpop.f32.mrb[9].mxu1  ;;  %v678_v55 = vpop.f32.mrb[9].mxu0 }
 0x21e   : > { %754 = vst [vmem:[#allocation2 + $0x8] sm:$0xff] %v738_v48  ;;  %756 = vst [vmem:[#allocation2 + $0x18] sm:$0xff] %v740_v49  ;;  %v606_v56 = vadd.f32 %v605_v54, %v2642_v20  ;;  %v679_v57 = vadd.f32 %v678_v55, %v2644_v21  ;;  %v607_v58 = vpop.f32.mrb[10].mxu1  ;;  %v680_v59 = vpop.f32.mrb[10].mxu0 }
 0x21f   : > { %v608_v60 = vadd.f32 %v607_v58, %v2638_v18  ;;  %v681_v61 = vadd.f32 %v680_v59, %v2640_v19  ;;  %v609_v62 = vpop.f32.mrb[11].mxu1  ;;  %v682_v63 = vpop.f32.mrb[11].mxu0  ;;  %v713_v10 = vmax.f32 %v604_v52, 0.0  ;;  %v715_v11 = vmax.f32 %v677_v53, 0.0 }
 0x220   : > { %v610_v8 = vadd.f32 %v609_v62, %v2642_v20  ;;  %v683_v9 = vadd.f32 %v682_v63, %v2644_v21  ;;  %v714_v14 = vmax.f32 %v606_v56, 0.0  ;;  %v716_v15 = vmax.f32 %v679_v57, 0.0 }
 0x221   : > { %v717_v12 = vmax.f32 %v608_v60, 0.0  ;;  %v719_v13 = vmax.f32 %v681_v61, 0.0 }
 0x222   : > { %v718_v16 = vmax.f32 %v610_v8, 0.0  ;;  %v720_v17 = vmax.f32 %v683_v9, 0.0 }
 0x223   : > { %v741_v22 = vpack.c.bf16 %v717_v12, %v713_v10  ;;  %v743_v23 = vpack.c.bf16 %v719_v13, %v715_v11 }
 0x224   : > { %v742_v24 = vpack.c.bf16 %v718_v16, %v714_v14  ;;  %v744_v25 = vpack.c.bf16 %v720_v17, %v716_v15  ;;  %v613_v26 = vpop.f32.mrb[12].mxu1  ;;  %v686_v27 = vpop.f32.mrb[12].mxu0 }
 0x225   : > { %757 = vst [vmem:[#allocation2 + $0x20] sm:$0xff] %v741_v22  ;;  %759 = vst [vmem:[#allocation2 + $0x30] sm:$0xff] %v743_v23  ;;  %v614_v28 = vadd.f32 %v613_v26, %v2638_v18  ;;  %v687_v29 = vadd.f32 %v686_v27, %v2640_v19  ;;  %v615_v30 = vpop.f32.mrb[13].mxu1  ;;  %v688_v31 = vpop.f32.mrb[13].mxu0 }
 0x226   : > { %758 = vst [vmem:[#allocation2 + $0x28] sm:$0xff] %v742_v24  ;;  %760 = vst [vmem:[#allocation2 + $0x38] sm:$0xff] %v744_v25  ;;  %v616_v32 = vadd.f32 %v615_v30, %v2642_v20  ;;  %v689_v33 = vadd.f32 %v688_v31, %v2644_v21  ;;  %v617_v34 = vpop.f32.mrb[14].mxu1  ;;  %v690_v35 = vpop.f32.mrb[14].mxu0 }
 0x227   : > { %v618_v36 = vadd.f32 %v617_v34, %v2638_v18  ;;  %v691_v37 = vadd.f32 %v690_v35, %v2640_v19  ;;  %v619_v38 = vpop.f32.mrb[15].mxu1  ;;  %v692_v39 = vpop.f32.mrb[15].mxu0  ;;  %v721_v42 = vmax.f32 %v614_v28, 0.0  ;;  %v723_v43 = vmax.f32 %v687_v29, 0.0 }
 0x228   : > { %v620_v40 = vadd.f32 %v619_v38, %v2642_v20  ;;  %v693_v41 = vadd.f32 %v692_v39, %v2644_v21  ;;  %v722_v46 = vmax.f32 %v616_v32, 0.0  ;;  %v724_v47 = vmax.f32 %v689_v33, 0.0 }
 0x229   : > { %v725_v44 = vmax.f32 %v618_v36, 0.0  ;;  %v727_v45 = vmax.f32 %v691_v37, 0.0 }
 0x22a   : > { %v726_v48 = vmax.f32 %v620_v40, 0.0  ;;  %v728_v49 = vmax.f32 %v693_v41, 0.0 }
 0x22b   : > { %v745_v50 = vpack.c.bf16 %v725_v44, %v721_v42  ;;  %v747_v51 = vpack.c.bf16 %v727_v45, %v723_v43 }
 0x22c   : > { %v746_v52 = vpack.c.bf16 %v726_v48, %v722_v46  ;;  %v748_v53 = vpack.c.bf16 %v728_v49, %v724_v47  ;;  %v623_v54 = vpop.f32.mrb[16].mxu1  ;;  %v696_v55 = vpop.f32.mrb[16].mxu0 }
 0x22d   : > { %761 = vst [vmem:[#allocation2 + $0x40] sm:$0xff] %v745_v50  ;;  %763 = vst [vmem:[#allocation2 + $0x50] sm:$0xff] %v747_v51  ;;  %v624_v56 = vadd.f32 %v623_v54, %v2638_v18  ;;  %v697_v57 = vadd.f32 %v696_v55, %v2640_v19  ;;  %v625_v58 = vpop.f32.mrb[17].mxu1  ;;  %v698_v59 = vpop.f32.mrb[17].mxu0 }
 0x22e   : > { %762 = vst [vmem:[#allocation2 + $0x48] sm:$0xff] %v746_v52  ;;  %764 = vst [vmem:[#allocation2 + $0x58] sm:$0xff] %v748_v53  ;;  %v626_v60 = vadd.f32 %v625_v58, %v2642_v20  ;;  %v699_v61 = vadd.f32 %v698_v59, %v2644_v21  ;;  %v627_v62 = vpop.f32.mrb[18].mxu1  ;;  %v700_v63 = vpop.f32.mrb[18].mxu0 }
 0x22f   : > { %v628_v8 = vadd.f32 %v627_v62, %v2638_v18  ;;  %v701_v9 = vadd.f32 %v700_v63, %v2640_v19  ;;  %v629_v10 = vpop.f32.mrb[19].mxu1  ;;  %v702_v11 = vpop.f32.mrb[19].mxu0  ;;  %v729_v14 = vmax.f32 %v624_v56, 0.0  ;;  %v731_v15 = vmax.f32 %v697_v57, 0.0 }
 0x230   : > { %v630_v12 = vadd.f32 %v629_v10, %v2642_v20  ;;  %v703_v13 = vadd.f32 %v702_v11, %v2644_v21  ;;  %v730_v22 = vmax.f32 %v626_v60, 0.0  ;;  %v732_v23 = vmax.f32 %v699_v61, 0.0 }
 0x231   : > { %v733_v16 = vmax.f32 %v628_v8, 0.0  ;;  %v735_v17 = vmax.f32 %v701_v9, 0.0 }
 0x232   : > { %v734_v24 = vmax.f32 %v630_v12, 0.0  ;;  %v736_v25 = vmax.f32 %v703_v13, 0.0 }
 0x233   : > { %v749_v26 = vpack.c.bf16 %v733_v16, %v729_v14  ;;  %v751_v27 = vpack.c.bf16 %v735_v17, %v731_v15 }
 0x234   : > { %v750_v28 = vpack.c.bf16 %v734_v24, %v730_v22  ;;  %v752_v18 = vpack.c.bf16 %v736_v25, %v732_v23 }
 0x235   : > { %765 = vst [vmem:[#allocation2 + $0x60] sm:$0xff] %v749_v26  ;;  %767 = vst [vmem:[#allocation2 + $0x70] sm:$0xff] %v751_v27 }
 0x236   : > { %766 = vst [vmem:[#allocation2 + $0x68] sm:$0xff] %v750_v28  ;;  %768 = vst [vmem:[#allocation2 + $0x78] sm:$0xff] %v752_v18 }
 0x237 PF: > { %v2113_v19 = vld [vmem:[%s2513_s23 + $0x40] sm:$0xff]   ;;  %v2117_v30 = vld [vmem:[%s2513_s23 + $0x48] sm:$0xff]   ;;  %v2121_v34 = vld [vmem:[%s2513_s23 + $0x50] sm:$0xff]   ;;  %v1859_v22 = vcombine.low %v2535_v0, %v2540_v1  ;;  %vm1210_vm5 = vcmask 523264   ;;  %p1901_p3 = scmp.ne.s32.totalorder %s2398_s28, 3 }
 0x238   : > { %v2114_v20 = vld [vmem:[%s2513_s23 + $0xc0] sm:$0xff]   ;;  %1919 = vmatprep.subr.bf16.mxu0 %v2113_v19  ;;  %v2118_v31 = vld [vmem:[%s2513_s23 + $0xc8] sm:$0xff]   ;;  %v2122_v35 = vld [vmem:[%s2513_s23 + $0xd0] sm:$0xff]   ;;  %vm1679_vm7 = vcmask (!%p1901_p3), 1040384   ;;  %vm1697_vm8 = vcmask (!%p1901_p3), 0  }
 0x239   : > { %v2115_v21 = vld [vmem:[%s2513_s23] sm:$0xff]   ;;  %1959 = vmatprep.subr.bf16.mxu1 %v2114_v20  ;;  %v2119_v32 = vld [vmem:[%s2513_s23 + $0x8] sm:$0xff]   ;;  %v2123_v36 = vld [vmem:[%s2513_s23 + $0x10] sm:$0xff]  }
 0x23a   : > { %v2116_v29 = vld [vmem:[%s2513_s23 + $0x80] sm:$0xff]   ;;  %1920 = vmatpush3.bf16.msra.mxu0 %v2115_v21  ;;  %v2120_v33 = vld [vmem:[%s2513_s23 + $0x88] sm:$0xff]   ;;  %v2124_v37 = vld [vmem:[%s2513_s23 + $0x90] sm:$0xff]  }
 0x23b   : > { %1960 = vmatpush3.bf16.msra.mxu1 %v2116_v29  ;;  %1921 = vmatprep.subr.bf16.mxu0 %v2117_v30  ;;  %v2125_v38 = vld [vmem:[%s2513_s23 + $0x58] sm:$0xff]   ;;  %v2129_v42 = vld [vmem:[%s2513_s23 + $0x60] sm:$0xff]   ;;  %v2133_v46 = vld [vmem:[%s2513_s23 + $0x68] sm:$0xff]  }
 0x23c   : > { %1961 = vmatprep.subr.bf16.mxu1 %v2118_v31  ;;  %v2126_v39 = vld [vmem:[%s2513_s23 + $0xd8] sm:$0xff]   ;;  %v2130_v43 = vld [vmem:[%s2513_s23 + $0xe0] sm:$0xff]   ;;  %v2134_v47 = vld [vmem:[%s2513_s23 + $0xe8] sm:$0xff]  }
 0x23d   : > { %v2127_v40 = vld [vmem:[%s2513_s23 + $0x18] sm:$0xff]   ;;  %v2131_v44 = vld [vmem:[%s2513_s23 + $0x20] sm:$0xff]   ;;  %v2135_v48 = vld [vmem:[%s2513_s23 + $0x28] sm:$0xff]  }
 0x23e   : > { %1922 = vmatpush3.bf16.msra.mxu0 %v2119_v32  ;;  %v2128_v41 = vld [vmem:[%s2513_s23 + $0x98] sm:$0xff]   ;;  %v2132_v45 = vld [vmem:[%s2513_s23 + $0xa0] sm:$0xff]   ;;  %v2136_v49 = vld [vmem:[%s2513_s23 + $0xa8] sm:$0xff]  }
 0x23f   : > { %1962 = vmatpush3.bf16.msra.mxu1 %v2120_v33  ;;  %1923 = vmatprep.subr.bf16.mxu0 %v2121_v34  ;;  %v2137_v50 = vld [vmem:[%s2513_s23 + $0x70] sm:$0xff]   ;;  %v2141_v54 = vld [vmem:[%s2513_s23 + $0x78] sm:$0xff]   ;;  %v775_v58 = vld [vmem:[#allocation2 + $0x8] sm:$0xff] }
 0x240   : > { %1963 = vmatprep.subr.bf16.mxu1 %v2122_v35  ;;  %v2138_v51 = vld [vmem:[%s2513_s23 + $0xf0] sm:$0xff]   ;;  %v2142_v55 = vld [vmem:[%s2513_s23 + $0xf8] sm:$0xff]   ;;  %1083 = vmatprep.mubr.bf16.mxu0 %v775_v58  ;;  %v779_v62 = vld [vmem:[#allocation2 + $0x28] sm:$0xff] }
 0x241   : > { %v2139_v52 = vld [vmem:[%s2513_s23 + $0x30] sm:$0xff]   ;;  %v2143_v56 = vld [vmem:[%s2513_s23 + $0x38] sm:$0xff]   ;;  %v783_v10 = vld [vmem:[#allocation2 + $0x48] sm:$0xff] }
 0x242   : > { %1924 = vmatpush3.bf16.msra.mxu0 %v2123_v36  ;;  %v2140_v53 = vld [vmem:[%s2513_s23 + $0xb0] sm:$0xff]   ;;  %v2144_v57 = vld [vmem:[%s2513_s23 + $0xb8] sm:$0xff]   ;;  %v787_v14 = vld [vmem:[#allocation2 + $0x68] sm:$0xff] }
 0x243   : > { %1964 = vmatpush3.bf16.msra.mxu1 %v2124_v37  ;;  %1925 = vmatprep.subr.bf16.mxu0 %v2125_v38  ;;  %v777_v59 = vld [vmem:[#allocation2 + $0x18] sm:$0xff]  ;;  %v774_v60 = vld [vmem:[#allocation2] sm:$0xff]  ;;  %v776_v61 = vld [vmem:[#allocation2 + $0x10] sm:$0xff] }
 0x244   : > { %1965 = vmatprep.subr.bf16.mxu1 %v2126_v39  ;;  %1148 = vmatprep.mubr.bf16.mxu1 %v777_v59  ;;  %v781_v63 = vld [vmem:[#allocation2 + $0x38] sm:$0xff]  ;;  %v778_v8 = vld [vmem:[#allocation2 + $0x20] sm:$0xff]  ;;  %v780_v9 = vld [vmem:[#allocation2 + $0x30] sm:$0xff] }
 0x245   : > { %v785_v11 = vld [vmem:[#allocation2 + $0x58] sm:$0xff]  ;;  %v782_v12 = vld [vmem:[#allocation2 + $0x40] sm:$0xff]  ;;  %v784_v13 = vld [vmem:[#allocation2 + $0x50] sm:$0xff] }
 0x246   : > { %1926 = vmatpush3.bf16.msra.mxu0 %v2127_v40  ;;  %v789_v15 = vld [vmem:[#allocation2 + $0x78] sm:$0xff]  ;;  %v786_v16 = vld [vmem:[#allocation2 + $0x60] sm:$0xff]  ;;  %v788_v17 = vld [vmem:[#allocation2 + $0x70] sm:$0xff] }
 0x247   : > { %1966 = vmatpush3.bf16.msra.mxu1 %v2128_v41  ;;  %1927 = vmatprep.subr.bf16.mxu0 %v2129_v42  ;;  %v2714_v25 = vld [vmem:[%s2530_s16] ss:$0 sm:$0xff] }
 0x248   : > { %1967 = vmatprep.subr.bf16.mxu1 %v2130_v43 }
 0x24a   : > { %1928 = vmatpush3.bf16.msra.mxu0 %v2131_v44 }
 0x24b   : > { %1968 = vmatpush3.bf16.msra.mxu1 %v2132_v45  ;;  %1929 = vmatprep.subr.bf16.mxu0 %v2133_v46 }
 0x24c   : > { %1969 = vmatprep.subr.bf16.mxu1 %v2134_v47 }
 0x24e   : > { %1930 = vmatpush3.bf16.msra.mxu0 %v2135_v48 }
 0x24f   : > { %1970 = vmatpush3.bf16.msra.mxu1 %v2136_v49  ;;  %1931 = vmatprep.subr.bf16.mxu0 %v2137_v50 }
 0x250   : > { %1971 = vmatprep.subr.bf16.mxu1 %v2138_v51 }
 0x252   : > { %1932 = vmatpush3.bf16.msra.mxu0 %v2139_v52 }
 0x253   : > { %1972 = vmatpush3.bf16.msra.mxu1 %v2140_v53  ;;  %1933 = vmatprep.subr.bf16.mxu0 %v2141_v54 }
 0x254   : > { %1973 = vmatprep.subr.bf16.mxu1 %v2142_v55 }
 0x256   : > { %1934 = vmatpush3.bf16.msra.mxu0 %v2143_v56 }
 0x257   : > { %1974 = vmatpush3.bf16.msra.mxu1 %v2144_v57 }
 0x259   : > { %1084 = vmatmul.mubr.bf16.vlgmr.msra.gmra.mrb[0].mxu0 %v774_v60 }
 0x25a   : > { %1149 = vmatmul.mubr.bf16.vlgmr.msra.gmra.mrb[0].mxu1 %v776_v61  ;;  %1091 = vmatprep.mubr.bf16.mxu0 %v779_v62 }
 0x25b   : > { %1156 = vmatprep.mubr.bf16.mxu1 %v781_v63 }
 0x261   : > { %1092 = vmatmul.mubr.bf16.gmra.mrb[4].mxu0 %v778_v8 }
 0x262   : > { %1157 = vmatmul.mubr.bf16.gmra.mrb[4].mxu1 %v780_v9  ;;  %1099 = vmatprep.mubr.bf16.mxu0 %v783_v10 }
 0x263   : > { %1164 = vmatprep.mubr.bf16.mxu1 %v785_v11 }
 0x269   : > { %1100 = vmatmul.mubr.bf16.gmra.mrb[8].mxu0 %v782_v12 }
 0x26a   : > { %1165 = vmatmul.mubr.bf16.gmra.mrb[8].mxu1 %v784_v13  ;;  %1107 = vmatprep.mubr.bf16.mxu0 %v787_v14 }
 0x26b   : > { %1172 = vmatprep.mubr.bf16.mxu1 %v789_v15 }
 0x271   : > { %1108 = vmatmul.mubr.bf16.gmra.mrb[12].mxu0 %v786_v16 }
 0x272   : > { %1173 = vmatmul.mubr.bf16.gmra.mrb[12].mxu1 %v788_v17  ;;  %2031 = vmatprep.mubr.msk.bf16.mxu0 %vm1210_vm5, %v1859_v22 }
 0x32c   : > { %v1935_v23 = vpop.f32.mrb[0].mxu0 }
 0x32d   : > { %v1975_v24 = vpop.f32.mrb[0].mxu1  ;;  %v1936_v26 = vpop.f32.mrb[1].mxu0 }
 0x32e   : > { %v1937_v27 = vadd.f32 %v1936_v26, %v1935_v23  ;;  %v1976_v28 = vpop.f32.mrb[1].mxu1  ;;  %v1938_v18 = vpop.f32.mrb[2].mxu0 }
 0x32f   : > { %v1977_v19 = vadd.f32 %v1976_v28, %v1975_v24  ;;  %v1978_v20 = vpop.f32.mrb[2].mxu1  ;;  %v1939_v21 = vpop.f32.mrb[3].mxu0 }
 0x330   : > { %v1086_v29 = vadd.f32 %v1937_v27, %v2714_v25  ;;  %v1940_v30 = vadd.f32 %v1939_v21, %v1938_v18  ;;  %v1979_v31 = vpop.f32.mrb[3].mxu1 }
 0x331   : > { %v1980_v32 = vadd.f32 %v1979_v31, %v1978_v20  ;;  %v1860_v31 = vcombine.low %v2545_v2, %v2550_v3  ;;  %v2145_v2 = vld [vmem:[%s2519_s19] ss:$16 sps:$4 sm:$0xff]   ;;  %v2148_v3 = vld [vmem:[%s2519_s19 + $0x8] ss:$16 sps:$4 sm:$0xff]  }
 0x332   : > { %v1151_v0 = vadd.f32 %v1977_v19, %v1086_v29  ;;  %v1089_v1 = vadd.f32 %v1940_v30, %v2714_v25 }
 0x334   : > { %v1154_v33 = vadd.f32 %v1980_v32, %v1089_v1  ;;  %v1941_v34 = vpop.f32.mrb[4].mxu0  ;;  %v1861_v32 = vcombine.low %v2555_v4, %v2560_v5  ;;  %v2150_v1 = vld [vmem:[%s2519_s19 + $0xc] ss:$16 sps:$4 sm:$0xff]   ;;  %v2153_v4 = vld [vmem:[%s2519_s19 + $0x24] ss:$16 sps:$4 sm:$0xff]  }
 0x335   : > { %v1981_v35 = vpop.f32.mrb[4].mxu1  ;;  %v1942_v36 = vpop.f32.mrb[5].mxu0  ;;  %v2156_v5 = vld [vmem:[%s2519_s19 + $0x2c] ss:$16 sps:$4 sm:$0xff]  }
 0x336   : > { %v1943_v37 = vadd.f32 %v1942_v36, %v1941_v34  ;;  %v1982_v38 = vpop.f32.mrb[5].mxu1  ;;  %v1944_v39 = vpop.f32.mrb[6].mxu0  ;;  %v1181_v40 = vpack.c.bf16 %v1154_v33, %v1151_v0  ;;  %v2147_v0 = vld [vmem:[%s2519_s19 + $0x4] ss:$16 sps:$4 sm:$0xff]   ;;  %v2151_v33 = vld [vmem:[%s2519_s19 + $0x20] ss:$16 sps:$4 sm:$0xff]  }
 0x337   : > { %v1983_v41 = vadd.f32 %v1982_v38, %v1981_v35  ;;  %v1984_v42 = vpop.f32.mrb[6].mxu1  ;;  %v1945_v43 = vpop.f32.mrb[7].mxu0  ;;  %1529 = vmatprep.subr.bf16.mxu1 %v2147_v0  ;;  %v2162_v34 = vld [vmem:[%s2519_s19 + $0x4c] ss:$16 sps:$4 sm:$0xff]   ;;  %v2157_v35 = vld [vmem:[%s2519_s19 + $0x40] ss:$16 sps:$4 sm:$0xff]  }
 0x338   : > { %v1094_v44 = vadd.f32 %v1943_v37, %v2714_v25  ;;  %v1946_v45 = vadd.f32 %v1945_v43, %v1944_v39  ;;  %v1985_v46 = vpop.f32.mrb[7].mxu1  ;;  %2023 = vmatprep.subr.bf16.mxu0 %v1181_v40  ;;  %1530 = vmatpush1.bf16.msra.mxu1 %v2145_v2  ;;  %v2160_v36 = vld [vmem:[%s2519_s19 + $0x48] ss:$16 sps:$4 sm:$0xff]   ;;  %v2165_v37 = vld [vmem:[%s2519_s19 + $0x64] ss:$16 sps:$4 sm:$0xff]  }
 0x339   : > { %v1986_v47 = vadd.f32 %v1985_v46, %v1984_v42  ;;  %2024 = vmatpush3.bf16.msra.mxu0 %v1181_v40  ;;  %1531 = vmatprep.subr.bf16.mxu1 %v2153_v4  ;;  %v2168_v38 = vld [vmem:[%s2519_s19 + $0x6c] ss:$16 sps:$4 sm:$0xff]   ;;  %v2163_v39 = vld [vmem:[%s2519_s19 + $0x60] ss:$16 sps:$4 sm:$0xff]   ;;  %v2166_v40 = vld [vmem:[%s2519_s19 + $0x68] ss:$16 sps:$4 sm:$0xff]  }
 0x33a   : > { %v1159_v48 = vadd.f32 %v1983_v41, %v1094_v44  ;;  %v1097_v49 = vadd.f32 %v1946_v45, %v2714_v25  ;;  %v2171_v41 = vld [vmem:[%s2519_s19 + $0x84] ss:$16 sps:$4 sm:$0xff]   ;;  %v2174_v42 = vld [vmem:[%s2519_s19 + $0x8c] ss:$16 sps:$4 sm:$0xff]   ;;  %v2169_v43 = vld [vmem:[%s2519_s19 + $0x80] ss:$16 sps:$4 sm:$0xff]  }
 0x33b   : > { %v2172_v44 = vld [vmem:[%s2519_s19 + $0x88] ss:$16 sps:$4 sm:$0xff]   ;;  %v2177_v45 = vld [vmem:[%s2519_s19 + $0xa4] ss:$16 sps:$4 sm:$0xff]   ;;  %v2180_v46 = vld [vmem:[%s2519_s19 + $0xac] ss:$16 sps:$4 sm:$0xff]  }
 0x33c   : > { %v1162_v50 = vadd.f32 %v1986_v47, %v1097_v49  ;;  %v1947_v51 = vpop.f32.mrb[8].mxu0  ;;  %1532 = vmatpush1.bf16.msra.mxu1 %v2151_v33  ;;  %v2175_v47 = vld [vmem:[%s2519_s19 + $0xa0] ss:$16 sps:$4 sm:$0xff]  }
 0x33d   : > { %v1987_v52 = vpop.f32.mrb[8].mxu1  ;;  %v1948_v53 = vpop.f32.mrb[9].mxu0  ;;  %v2181_v49 = vld [vmem:[%s2519_s19 + $0xc0] ss:$16 sps:$4 sm:$0xff]  }
 0x33e   : > { %v1949_v54 = vadd.f32 %v1948_v53, %v1947_v51  ;;  %v1988_v55 = vpop.f32.mrb[9].mxu1  ;;  %v1950_v56 = vpop.f32.mrb[10].mxu0  ;;  %v1182_v57 = vpack.c.bf16 %v1162_v50, %v1159_v48  ;;  %v2178_v48 = vld [vmem:[%s2519_s19 + $0xa8] ss:$16 sps:$4 sm:$0xff]   ;;  %v2183_v50 = vld [vmem:[%s2519_s19 + $0xc4] ss:$16 sps:$4 sm:$0xff]  }
 0x33f   : > { %v1989_v58 = vadd.f32 %v1988_v55, %v1987_v52  ;;  %v1990_v59 = vpop.f32.mrb[10].mxu1  ;;  %v1951_v60 = vpop.f32.mrb[11].mxu0  ;;  %v2184_v51 = vld [vmem:[%s2519_s19 + $0xc8] ss:$16 sps:$4 sm:$0xff]   ;;  %v2186_v52 = vld [vmem:[%s2519_s19 + $0xcc] ss:$16 sps:$4 sm:$0xff]  }
 0x340   : > { %v1102_v61 = vadd.f32 %v1949_v54, %v2714_v25  ;;  %v1952_v62 = vadd.f32 %v1951_v60, %v1950_v56  ;;  %v1991_v63 = vpop.f32.mrb[11].mxu1  ;;  %2025 = vmatprep.subr.bf16.mxu0 %v1182_v57  ;;  %v2189_v53 = vld [vmem:[%s2519_s19 + $0xe4] ss:$16 sps:$4 sm:$0xff]   ;;  %v2192_v54 = vld [vmem:[%s2519_s19 + $0xec] ss:$16 sps:$4 sm:$0xff]   ;;  %v2336_v55 = vmov 0  }
 0x341   : > { %v1992_v8 = vadd.f32 %v1991_v63, %v1990_v59  ;;  %2026 = vmatpush3.bf16.msra.mxu0 %v1182_v57  ;;  %1561 = vmatprep.mubr.bf16.mxu1 %v2336_v55  ;;  %v2187_v56 = vld [vmem:[%s2519_s19 + $0xe0] ss:$16 sps:$4 sm:$0xff]   ;;  %v2190_v57 = vld [vmem:[%s2519_s19 + $0xe8] ss:$16 sps:$4 sm:$0xff]   ;;  %v1858_v59 = vld [vmem:[%s2530_s16 + $0x1] ss:$0 sm:$0xff] }
 0x342   : > { %v1167_v9 = vadd.f32 %v1989_v58, %v1102_v61  ;;  %v1105_v10 = vadd.f32 %v1952_v62, %v2714_v25 }
 0x344   : > { %v1170_v11 = vadd.f32 %v1992_v8, %v1105_v10  ;;  %v1953_v12 = vpop.f32.mrb[12].mxu0 }
 0x345   : > { %v1993_v13 = vpop.f32.mrb[12].mxu1  ;;  %v1954_v14 = vpop.f32.mrb[13].mxu0 }
 0x346   : > { %v1955_v15 = vadd.f32 %v1954_v14, %v1953_v12  ;;  %v1994_v16 = vpop.f32.mrb[13].mxu1  ;;  %v1956_v17 = vpop.f32.mrb[14].mxu0  ;;  %v1183_v22 = vpack.c.bf16 %v1170_v11, %v1167_v9  ;;  %v1867_v12 = vld [vmem:[%s2530_s16 + $0x2] ss:$0 sm:$0xff] }
 0x347   : > { %v1995_v23 = vadd.f32 %v1994_v16, %v1993_v13  ;;  %v1996_v24 = vpop.f32.mrb[14].mxu1  ;;  %v1957_v26 = vpop.f32.mrb[15].mxu0 }
 0x348   : > { %v1110_v27 = vadd.f32 %v1955_v15, %v2714_v25  ;;  %v1958_v28 = vadd.f32 %v1957_v26, %v1956_v17  ;;  %v1997_v18 = vpop.f32.mrb[15].mxu1  ;;  %2027 = vmatprep.subr.bf16.mxu0 %v1183_v22 }
 0x349   : > { %v1998_v19 = vadd.f32 %v1997_v18, %v1996_v24  ;;  %2028 = vmatpush3.bf16.msra.mxu0 %v1183_v22 }
 0x34a   : > { %v1175_v20 = vadd.f32 %v1995_v23, %v1110_v27  ;;  %v1113_v21 = vadd.f32 %v1958_v28, %v2714_v25  ;;  %v1862_v25 = vcombine.low %v2565_v6, %v2570_v7  ;;  %v2154_v6 = vld [vmem:[%s2519_s19 + $0x28] ss:$16 sps:$4 sm:$0xff]   ;;  %v2159_v7 = vld [vmem:[%s2519_s19 + $0x44] ss:$16 sps:$4 sm:$0xff]  }
 0x34b   : > { %1533 = vmatprep.subr.bf16.mxu1 %v2159_v7 }
 0x34c   : > { %v1178_v29 = vadd.f32 %v1998_v19, %v1113_v21  ;;  %1534 = vmatpush1.bf16.msra.mxu1 %v2157_v35  ;;  %v1868_v19 = vld [vmem:[%s2530_s16 + $0x3] ss:$0 sm:$0xff] }
 0x34d   : > { %1535 = vmatprep.subr.bf16.mxu1 %v2165_v37 }
 0x34e   : > { %v1184_v30 = vpack.c.bf16 %v1178_v29, %v1175_v20 }
 0x350   : > { %2029 = vmatprep.subr.bf16.mxu0 %v1184_v30  ;;  %1536 = vmatpush1.bf16.msra.mxu1 %v2163_v39 }
 0x351   : > { %2030 = vmatpush3.bf16.msra.mxu0 %v1184_v30  ;;  %1537 = vmatprep.subr.bf16.mxu1 %v2171_v41 }
 0x352   : > { %1570 = vmatprep.subr.bf16.mxu0 %v2150_v1 }
 0x354   : > { %2032 = vmatmul.mubr.msk.bf16.vlgmr.msra.gmra.mrb[16].mxu0 %vm1210_vm5, %v1860_v31  ;;  %1538 = vmatpush1.bf16.msra.mxu1 %v2169_v43 }
 0x355   : > { %2035 = vmatprep.mubr.msk.bf16.mxu0 %vm1210_vm5, %v1861_v32  ;;  %1571 = vmatpush1.bf16.msra.mxu0 %v2148_v3 }
 0x356   : > { %1572 = vmatprep.subr.bf16.mxu0 %v2156_v5  ;;  %1539 = vmatprep.subr.bf16.mxu1 %v2177_v45 }
 0x358   : > { %1540 = vmatpush1.bf16.msra.mxu1 %v2175_v47 }
 0x359   : > { %1573 = vmatpush1.bf16.msra.mxu0 %v2154_v6  ;;  %1541 = vmatprep.subr.bf16.mxu1 %v2183_v50 }
 0x35a   : > { %1574 = vmatprep.subr.bf16.mxu0 %v2162_v34 }
 0x35c   : > { %2036 = vmatmul.mubr.msk.bf16.gmra.mrb[20].mxu0 %vm1210_vm5, %v1862_v25  ;;  %1542 = vmatpush1.bf16.msra.mxu1 %v2181_v49 }
 0x35d   : > { %1575 = vmatpush1.bf16.msra.mxu0 %v2160_v36  ;;  %1543 = vmatprep.subr.bf16.mxu1 %v2189_v53  ;;  %v1620_v53 = vlaneseq }
 0x35e   : > { %1576 = vmatprep.subr.bf16.mxu0 %v2168_v38  ;;  %1602 = vmatprep.mubr.bf16.mxu0 %v2336_v55 }
 0x35f   : > { %v1621_v55 = vshrl.u32 %v1620_v53, 7  ;;  %vm1643_vm6 = vcmp.lt.s32.totalorder %v1620_v53, 512 }
 0x360   : > { %1544 = vmatpush1.bf16.msra.mxu1 %v2187_v56 }
 0x361   : > { %1577 = vmatpush1.bf16.msra.mxu0 %v2166_v40 }
 0x362   : > { %1578 = vmatprep.subr.bf16.mxu0 %v2174_v42 }
 0x365   : > { %1579 = vmatpush1.bf16.msra.mxu0 %v2172_v44 }
 0x366   : > { %1580 = vmatprep.subr.bf16.mxu0 %v2180_v46 }
 0x369   : > { %1581 = vmatpush1.bf16.msra.mxu0 %v2178_v48 }
 0x36a   : > { %1582 = vmatprep.subr.bf16.mxu0 %v2186_v52 }
 0x36d   : > { %1583 = vmatpush1.bf16.msra.mxu0 %v2184_v51  ;;  %v2337_v51 = vmov 1966171168  }
 0x36e   : > { %1584 = vmatprep.subr.bf16.mxu0 %v2192_v54  ;;  %v1618_v52 = vunpack.c.l.s4 %v2337_v51 }
 0x370   : > { %v1619_v54 = vunpack.c.0.s8 %v1618_v52 }
 0x371   : > { %1585 = vmatpush1.bf16.msra.mxu0 %v2190_v57 }
 0x427   : > { %v2033_v58 = vpop.f32.mrb[16].mxu0 }
 0x428   : > { %v1257_v60 = vpop.f32.mrb[17].mxu0  ;;  %v1266_v62 = vadd.f32 %v2033_v58, %v1858_v59  ;;  %v1622_v58 = vsub.s32 %v1619_v54, %v1621_v55 }
 0x429   : > { %v2034_v61 = vpop.f32.mrb[18].mxu0  ;;  %v1258_v8 = vadd.f32 %v1858_v59, %v1257_v60 }
 0x42a   : > { %v1260_v63 = vpop.f32.mrb[19].mxu0  ;;  %v1269_v9 = vadd.f32 %v2034_v61, %v1858_v59  ;;  %v1290_v11 = vmax.f32 %v1266_v62, 0.0 }
 0x42b   : > { %v1261_v10 = vadd.f32 %v1858_v59, %v1260_v63  ;;  %v1288_v13 = vmax.f32 %v1258_v8, 0.0 }
 0x42c   : > { %v1291_v15 = vmax.f32 %v1269_v9, 0.0  ;;  %v1303_v26 = vmul.f32 %v1867_v12, %v1290_v11 }
 0x42d   : > { %v1289_v22 = vmax.f32 %v1261_v10, 0.0  ;;  %v1301_v20 = vmul.f32 %v1867_v12, %v1288_v13 }
 0x42e   : > { %v1304_v30 = vmul.f32 %v1867_v12, %v1291_v15  ;;  %v1316_v2 = vadd.f32 %v1868_v19, %v1303_v26  ;;  %v1661_v26 = vsub.s32 (!%p1901_p3), 0, %v1621_v55 }
 0x42f   : > { %v2037_v14 = vpop.f32.mrb[20].mxu0  ;;  %v1302_v25 = vmul.f32 %v1867_v12, %v1289_v22  ;;  %v1314_v5 = vadd.f32 %v1868_v19, %v1301_v20  ;;  %v1902_v22 = vld [vmem:[%s2819_s5 + $0x1] ss:$8 sm:$0xf] (!%p1901_p3) }
 0x430   : > { %v1282_v16 = vadd.f32 %v2037_v14, %v1858_v59  ;;  %v1273_v17 = vpop.f32.mrb[21].mxu0  ;;  %v1317_v7 = vadd.f32 %v1868_v19, %v1304_v30  ;;  %v1335_v14 = vld [vmem:[#allocation3] sm:$0xf] }
 0x431   : > { %v1274_v23 = vadd.f32 %v1858_v59, %v1273_v17  ;;  %v2038_v24 = vpop.f32.mrb[22].mxu0  ;;  %v1315_v36 = vadd.f32 %v1868_v19, %v1302_v25 }
 0x432   : > { %v1294_v27 = vmax.f32 %v1282_v16, 0.0  ;;  %v1285_v28 = vadd.f32 %v2038_v24, %v1858_v59  ;;  %v1276_v18 = vpop.f32.mrb[23].mxu0  ;;  %v1903_v24 = vld [vmem:[%s2819_s5 + $0x2] ss:$8 sm:$0xf] (!%p1901_p3) }
 0x433   : > { %v1292_v21 = vmax.f32 %v1274_v23, 0.0  ;;  %v1277_v29 = vadd.f32 %v1858_v59, %v1276_v18  ;;  %v1669_v18 = vsub.s32 (!%p1901_p3), 2, %v1621_v55 }
 0x434   : > { %v1307_v31 = vmul.f32 %v1867_v12, %v1294_v27  ;;  %v1295_v32 = vmax.f32 %v1285_v28, 0.0  ;;  %v1665_v28 = vsub.s32 (!%p1901_p3), 1, %v1621_v55 }
 0x435   : > { %v1305_v0 = vmul.f32 %v1867_v12, %v1292_v21  ;;  %v1293_v1 = vmax.f32 %v1277_v29, 0.0 }
 0x436   : > { %v1320_v3 = vadd.f32 %v1868_v19, %v1307_v31  ;;  %v1308_v4 = vmul.f32 %v1867_v12, %v1295_v32 }
 0x437   : > { %v1318_v33 = vadd.f32 %v1868_v19, %v1305_v0  ;;  %v1306_v6 = vmul.f32 %v1867_v12, %v1293_v1 }
 0x438   : > { %v1324_v34 = vmax.f32 %v1316_v2, %v1320_v3  ;;  %v1321_v35 = vadd.f32 %v1868_v19, %v1308_v4 }
 0x439   : > { %v1322_v37 = vmax.f32 %v1314_v5, %v1318_v33  ;;  %v1319_v38 = vadd.f32 %v1868_v19, %v1306_v6  ;;  %v1673_v19 = vsub.s32 (!%p1901_p3), 3, %v1621_v55  ;;  %v1689_v5 = vld [vmem:[%s2819_s5 + $0x3] ss:$0 sm:$0xff] (!%p1901_p3) }
 0x43a   : > { %v1325_v39 = vmax.f32 %v1317_v7, %v1321_v35 }
 0x43b   : > { %v1323_v40 = vmax.f32 %v1315_v36, %v1319_v38 }
 0x43c   : > { %v1327_v41 = vmax.f32 %v1324_v34, %v1325_v39 }
 0x43d   : > { %v1326_v42 = vmax.f32 %v1322_v37, %v1323_v40 }
 0x43f   : > { %v1328_v43 = vmax.f32 %v1326_v42, %v1327_v41 }
 0x441   : > { %v1329_v44 = vrot.slane %v1328_v43, 4 }
 0x443   : > { %v1330_v45 = vmax.f32 %v1328_v43, %v1329_v44 }
 0x445   : > { %v1331_v46 = vrot.slane %v1330_v45, 2 }
 0x447   : > { %v1332_v47 = vmax.f32 %v1330_v45, %v1331_v46 }
 0x449   : > { %v1333_v48 = vrot.slane %v1332_v47, 1 }
 0x44b   : > { %v1334_v49 = vmax.f32 %v1332_v47, %v1333_v48 }
 0x44d   : > { %v1336_v50 = vpack.c.bf16 %v1334_v49, %v1334_v49 }
 0x44f   : > { %1562 = vmatmul.mubr.bf16.vlgmr.msra.gmra.mrb[16].mxu1 %v1336_v50  ;;  %1603 = vmatmul.mubr.bf16.vlgmr.msra.gmra.mrb[24].mxu0 %v1336_v50 }
 0x522   : > { %v1563_v56 = vpop.f32.mrb[16].mxu1  ;;  %v1604_v57 = vpop.f32.mrb[24].mxu0 }
 0x523   : > { %v1565_v59 = vpop.f32.mrb[17].mxu1  ;;  %v1606_v60 = vpop.f32.mrb[25].mxu0 }
 0x524   : > { %v1615_v61 = vcombine.low %v1563_v56, %v1565_v59  ;;  %v1616_v62 = vcombine.low %v1604_v57, %v1606_v60  ;;  %v1567_v63 = vpop.f32.mrb[18].mxu1  ;;  %v1608_v8 = vpop.f32.mrb[26].mxu0 }
 0x525   : > { %v1568_v9 = vpop.f32.mrb[19].mxu1  ;;  %v1609_v10 = vpop.f32.mrb[27].mxu0 }
 0x526   : > { %v1623_v11 = vrot.slane %v1615_v61, %v1622_v58  ;;  %v1630_v12 = vrot.slane %v1616_v62, %v1622_v58 }
 0x528   : > { %v1631_v13 = vcombine.low %v1623_v11, %v1630_v12  ;;  %1649 = sbr.rel (%p1901_p3) target bundleno = 1520 (0x5f0), region = 64 }
 0x52a   : > { %v1638_v15 = vrot.slane %v1631_v13, %v1622_v58 }
 0x52c   : > { %v1640_v16 = vadd.f32 %v1638_v15, %v1335_v14 }
 0x52e   : > { %1645 = vst.msk [vmem:[#allocation3] sm:$0xf] %vm1643_vm6, %v1640_v16 }
 0x535   : > { %v1650_v17 = vld [vmem:[#allocation3] sm:$0xf] }
 0x536   : > { %v1653_v23 = vadd.f32 %v1902_v22, %v1650_v17 }
 0x538   : > { %v1654_v27 = vmax.f32 %v1653_v23, 0.0 }
 0x53a   : > { %v1657_v20 = vmul.f32 %v1903_v24, %v1654_v27 }
 0x53c   : > { %v1662_v21 = vrot.slane %v1657_v20, %v1661_v26  ;;  %v1666_v29 = vrot.slane %v1657_v20, %v1665_v28  ;;  %v1670_v30 = vrot.slane %v1657_v20, %v1669_v18  ;;  %v1674_v31 = vrot.slane %v1657_v20, %v1673_v19 }
 0x53e   : > { %v1680_v32 = vsel %vm1679_vm7, %v1662_v21, 0.0  ;;  %v1681_v25 = vsel %vm1679_vm7, %v1666_v29, 0.0  ;;  %v1683_v0 = vsel %vm1679_vm7, %v1670_v30, 0.0  ;;  %v1685_v2 = vsel %vm1679_vm7, %v1674_v31, 0.0 }
 0x53f   : > { %v1682_v1 = vadd.f32 %v1681_v25, %v1680_v32 }
 0x541   : > { %v1684_v3 = vadd.f32 %v1683_v0, %v1682_v1 }
 0x543   : > { %v1686_v4 = vadd.f32 %v1685_v2, %v1684_v3 }
 0x545   : > { %1687 = vadd.xlane.f32.xlu0 %v1686_v4 }
 0x5d2   : > { %v1688_v33 = vpop.xlane.xlu0 %1687 }
 0x5d3   : > { %v1690_v6 = vadd.f32 %v1689_v5, %v1688_v33 }
 0x5d5   : > { %v1904_v7 = vmul.f32 -1.442695, %v1690_v6 }
 0x5d7   : > { %2193 = vpow2.f32 %v1904_v7 }
 0x5e1   : > { %v2194_v34 = vpop.eup %2193 }
 0x5e2   : > { %v1694_v35 = vadd.f32 1.0, %v2194_v34 }
 0x5e4   : > { %2195 = vrcp.f32 %v1694_v35 }
 0x5ee   : > { %v2196_v36 = vpop.eup %2195 }
 0x5ef   : > { %1698 = vst.msk [vmem:[#allocation9] sm:$0x1] %vm1697_vm8, %v2196_v36 }
 0x5f0 PF: > { %p2063_p6 = scmp.eq.s32.totalorder %s2398_s28, 3  ;;  %s2338_s10 = smov [#allocation9]  }
 0x5f1   : > { %s1706_s15 = sshll.u32 %s2338_s10, 4  ;;  %s1707_s15 = int_to_ptr.vmem [resolvable:$true] %s1706_s15 }
 0x5f2   : > { %s2257_s18 = scalar_lea.vmem %s1707_s15, 16  ;;  %s2263_s27 = scalar_lea.vmem %s1707_s15, 32 }
 0x5f3   : > { %p2258_p0 = scmp.ne.s32.totalorder %s1707_s15, %s2257_s18  ;;  %p2264_p2 = scmp.lt.s32.totalorder %s1707_s15, %s1707_s15 }
 0x5f4   : > { %p2265_p4 = scmp.lt.s32.totalorder %s2263_s27, %s2257_s18 }
 0x5f5   : > { %p2259_p1 = pnand %p2258_p0, %p2063_p6 }
 0x5f6   : > { %p2266_p5 = por %p2265_p4, %p2264_p2 }
 0x5f7   : > { %p2260_p12 = pneg %p2259_p1 }
 0x5f9   : > { %p2267_p9 = pnand %p2266_p5, %p2260_p12 }
 0x5fb   : > { %2270 = shalt.err (!%p2267_p9)
}
 0x5fc   : > { %s2271_s11 = scalar_lea.hbm %s2821_s7, 16 }
 0x5fd   : > { %p2272_p11 = scmp.ne.s32.totalorder %s2821_s7, %s2271_s11  ;;  %p2277_p8 = scmp.lt.u32.totalorder %s2271_s11, %s2821_s7 }
 0x5ff   : > { %p2273_p13 = pnand %p2272_p11, %p2063_p6 }
 0x601   : > { %p2274_p7 = pneg %p2273_p13 }
 0x603   : > { %p2279_p10 = pnand %p2277_p8, %p2274_p7 }
 0x605   : > { %2282 = shalt.err (!%p2279_p10)
}
 0x606   : > { %2052 = dma.vmem_to_hbm [thread:$0]  (%p2063_p6), %s1707_s15, 16, %s2821_s7, [#allocation6]  }
 0x607   : > { %2308 = dma.done.wait (%p2063_p6), [#allocation6], 16  }
 0x608   : > { %2310 = vsyncadd (%p2063_p6), [#allocation6], 4294967280 }
 0x609 PF: > { %p21_p3 = scmp.ge.s32.totalorder %s2401_s29, 6   ;;  %s2827_s24 = smov %s2317_s25 }
 0x60a   : > { %s2828_s25 = smov %s2321_s26  ;;  %s2829_s26 = smov %s2411_s9 }
 0x60b   : > { %s2830_s27 = smov %s2401_s29  ;;  %23 = sbr.rel (!%p21_p3) target bundleno = 6 (0x6), region = 111 }
 0x612   :  { %1719 = vsyncpa [#allocation5], 1 }
 0x613   :  { %1721 = vsyncpa [#allocation5 + $0x1], 1 }
 0x614   :  { %1722 = vsyncpa [#allocation8], 1 }
 0x615   :  { %1724 = vsyncpa [#allocation8 + $0x1], 1 }
 0x616   :  { %1725 = vsyncpa [#allocation6], 1 }
 0x617   :  { %1727 = vsyncpa [#allocation6 + $0x1], 1 }

</bundles_post_ra>
